<compile_context>
chip_gen: v6e
topology: v6e:2x2x1
jax: 0.10.0
libtpu: 0.0.40
codegen_flags: <defaults>
</compile_context>

<pallas_src>
import jax
import jax.numpy as jnp
from jax import lax
from jax.experimental import pallas as pl
from jax.experimental.pallas import tpu as pltpu


def _round_up(v, m):
    return ((v + m - 1) // m) * m


def _fused_lstm_kernel(x_ref, wx_ref, wh_ref, b_ref, y_ref, hN_ref, cN_ref):
    """All layers and all timesteps of the stacked LSTM in one invocation.

    x_ref  : (T*Bp, IN)  time-major input, flattened (row = t*Bp + b), zero-padded
    wx_ref : (L, IN, 4H) per-layer W_ih^T (rows beyond the real input width are zero)
    wh_ref : (L, H, 4H)  per-layer W_hh^T
    b_ref  : (L, 1, 4H)  per-layer b_ih + b_hh
    y_ref  : (T*Bp, H)   top-layer hidden sequence (flattened like x_ref)
    hN_ref : (L, Bp, H)  last-timestep h per layer
    cN_ref : (L, Bp, H)  last-timestep c per layer
    """
    TB, IN = x_ref.shape
    L, Bp, H = hN_ref.shape
    T = TB // Bp
    G = 4 * H
    f32 = jnp.float32

    # ---- hoisted constants (built once; never rebuilt inside the unrolled body) ----
    # tanh pre-scale lane mask: sigmoid(x) = 0.5*(1 + tanh(x/2)) -> scale the i/f/o
    # lane groups by 0.5, leave the g group (columns [2H, 3H)) at 1.0.
    lane = lax.broadcasted_iota(jnp.int32, (Bp, G), 1)
    pre = jnp.where((lane >= 2 * H) & (lane < 3 * H), 1.0, 0.5).astype(f32)

    # ---- per-layer weights / biases, loaded & broadcast once ----
    wh = [wh_ref[l] for l in range(L)]                         # (H, 4H) each
    # Recurrent-input W_ih^T for layers >= 1: only the first H rows are real
    # (pack_lstm_params zero-pads rows [H:IN)).
    wx_rec = [wx_ref[l][0:H, :] for l in range(1, L)]          # (H, 4H) each
    b_rec = [jnp.broadcast_to(b_ref[l], (Bp, G)) for l in range(1, L)]

    # ---- layer-0 x-side GEMM + bias, batched over all timesteps ----
    # One (T*Bp, IN) x (IN, 4H) MXU push; completely off the recurrence chain.
    xg0 = (jnp.dot(x_ref[...], wx_ref[0], preferred_element_type=f32)
           + b_ref[0])                                         # (T*Bp, 4H)

    def cell(gates, c_prev):
        # Single EUP tanh pass over the full (Bp, 4H) vreg, then static lane slices
        # in torch gate order [i, f, g, o]; i/f/o recovered via the sigmoid identity.
        t_all = jnp.tanh(gates * pre)
        i_g = 0.5 * t_all[:, 0 * H:1 * H] + 0.5
        f_g = 0.5 * t_all[:, 1 * H:2 * H] + 0.5
        g_g = t_all[:, 2 * H:3 * H]
        o_g = 0.5 * t_all[:, 3 * H:4 * H] + 0.5
        c_new = f_g * c_prev + i_g * g_g
        h_new = o_g * jnp.tanh(c_new)
        return h_new, c_new

    h = [jnp.zeros((Bp, H), f32) for _ in range(L)]
    c = [jnp.zeros((Bp, H), f32) for _ in range(L)]

    # ---- (layer, time) wavefront over s = 0 .. T+L-2 ----
    # At global step s, layer l processes time t = s - l.  Layers are visited in
    # DESCENDING order so that h[l-1] still holds layer l-1's output at time t when
    # layer l reads it (layer l-1 only advances to t+1 later in the same body).
    # The per-layer chains inside one step are independent -> the scheduler overlaps
    # their MXU/EUP/VPU latencies.
    for s in range(T + L - 1):
        for l in range(L - 1, -1, -1):
            t = s - l
            if 0 <= t < T:
                if l == 0:
                    gates = (xg0[t * Bp:(t + 1) * Bp, :]
                             + jnp.dot(h[0], wh[0], preferred_element_type=f32))
                else:
                    gates = (jnp.dot(h[l - 1], wx_rec[l - 1],
                                     preferred_element_type=f32)
                             + jnp.dot(h[l], wh[l], preferred_element_type=f32)
                             + b_rec[l - 1])
                h[l], c[l] = cell(gates, c[l])
                if l == L - 1:
                    # Top layer writes straight to the output; no trailing copy.
                    y_ref[t * Bp:(t + 1) * Bp, :] = h[l].astype(y_ref.dtype)

    for l in range(L):
        hN_ref[l] = h[l].astype(hN_ref.dtype)
        cN_ref[l] = c[l].astype(cN_ref.dtype)


@jax.jit
def _lstm_forward_packed(x, wx_packed, wh_packed, b_packed):
    """x: (B, T, F) -> (output (B, T, H), (h_n (L, B, H), c_n (L, B, H)))."""
    B, T, F = x.shape
    L, IN, G = wx_packed.shape
    H = G // 4
    Bp = _round_up(max(B, 1), 8)                # sublane-aligned batch

    # Equivalent of x.permute(1, 0, 2), plus zero padding of batch and features,
    # flattened time-major so the kernel only ever sees sublane-aligned 2-D slabs.
    x_tm = jnp.transpose(x, (1, 0, 2)).astype(jnp.float32)              # (T, B, F)
    x_p = jnp.zeros((T, Bp, IN), jnp.float32).at[:, :B, :F].set(x_tm)
    x_flat = x_p.reshape(T * Bp, IN)

    vmem = pl.BlockSpec(memory_space=pltpu.MemorySpace.VMEM)
    y, h_n, c_n = pl.pallas_call(
        _fused_lstm_kernel,
        out_shape=(
            jax.ShapeDtypeStruct((T * Bp, H), jnp.float32),
            jax.ShapeDtypeStruct((L, Bp, H), jnp.float32),
            jax.ShapeDtypeStruct((L, Bp, H), jnp.float32),
        ),
        in_specs=[vmem, vmem, vmem, vmem],
        out_specs=(vmem, vmem, vmem),
    )(x_flat, wx_packed, wh_packed, b_packed)

    y = y.reshape(T, Bp, H)
    output = jnp.transpose(y[:, :B, :], (1, 0, 2)).astype(x.dtype)      # (B, T, H)
    hidden = (h_n[:, :B, :].astype(x.dtype), c_n[:, :B, :].astype(x.dtype))
    return output, hidden


def init_lstm_params(key, n_features, n_hidden, n_layers, dtype=jnp.float32):
    """torch.nn.LSTM-style params per layer: (w_ih (4H,in), w_hh (4H,H), b_ih, b_hh)."""
    params = []
    bound = 1.0 / (n_hidden ** 0.5)
    for layer in range(n_layers):
        in_size = n_features if layer == 0 else n_hidden
        key, k1, k2, k3, k4 = jax.random.split(key, 5)
        w_ih = jax.random.uniform(k1, (4 * n_hidden, in_size), dtype, -bound, bound)
        w_hh = jax.random.uniform(k2, (4 * n_hidden, n_hidden), dtype, -bound, bound)
        b_ih = jax.random.uniform(k3, (4 * n_hidden,), dtype, -bound, bound)
        b_hh = jax.random.uniform(k4, (4 * n_hidden,), dtype, -bound, bound)
        params.append((w_ih, w_hh, b_ih, b_hh))
    return params


def pack_lstm_params(params, n_features, n_hidden):
    """Pack per-layer torch-shaped params into stacked, padded, pre-transposed arrays.

    wx_packed: (L, IN, 4H)  W_ih^T, zero-padded rows up to IN = round_up(max(F, H), 8)
               (the zero rows beyond each layer's real input width are load-bearing:
                they guarantee padded input columns contribute nothing)
    wh_packed: (L, H, 4H)   W_hh^T
    b_packed : (L, 1, 4H)   b_ih + b_hh
    """
    H = n_hidden
    IN = _round_up(max(n_features, H), 8)
    wx_list, wh_list, b_list = [], [], []
    for (w_ih, w_hh, b_ih, b_hh) in params:
        in_size = w_ih.shape[1]
        wx = jnp.zeros((IN, 4 * H), jnp.float32).at[:in_size, :].set(
            w_ih.T.astype(jnp.float32))
        wx_list.append(wx)
        wh_list.append(w_hh.T.astype(jnp.float32))
        b_list.append((b_ih + b_hh).astype(jnp.float32)[None, :])
    return jnp.stack(wx_list), jnp.stack(wh_list), jnp.stack(b_list)


def build_lstm_forward(x, packed_params):
    """Equivalent of build_lstm.forward (self.linear is unused in the original)."""
    wx_packed, wh_packed, b_packed = packed_params
    return _lstm_forward_packed(x, wx_packed, wh_packed, b_packed)


def _lstm_reference(x, params):
    """Pure-JAX reference (torch.nn.LSTM semantics) for correctness checking."""
    hi = jax.lax.Precision.HIGHEST
    x_tm = jnp.transpose(x, (1, 0, 2)).astype(jnp.float32)
    T = x_tm.shape[0]
    layer_in = x_tm
    h_list, c_list = [], []
    for (w_ih, w_hh, b_ih, b_hh) in params:
        H = w_hh.shape[1]
        B = layer_in.shape[1]
        h = jnp.zeros((B, H), jnp.float32)
        c = jnp.zeros((B, H), jnp.float32)
        outs = []
        for t in range(T):
            g = (jnp.dot(layer_in[t], w_ih.T, precision=hi)
                 + jnp.dot(h, w_hh.T, precision=hi) + b_ih + b_hh)
            i = jax.nn.sigmoid(g[:, :H])
            f = jax.nn.sigmoid(g[:, H:2 * H])
            gg = jnp.tanh(g[:, 2 * H:3 * H])
            o = jax.nn.sigmoid(g[:, 3 * H:4 * H])
            c = f * c + i * gg
            h = o * jnp.tanh(c)
            outs.append(h)
        layer_in = jnp.stack(outs, axis=0)
        h_list.append(h)
        c_list.append(c)
    return (jnp.transpose(layer_in, (1, 0, 2)),
            (jnp.stack(h_list, axis=0), jnp.stack(c_list, axis=0)))


if __name__ == "__main__":
    # Small shapes consistent with the module: batch=2, seq=8, features=4,
    # hidden=32, layers=2.
    batch, seq, n_features, n_hidden, n_layers = 2, 8, 4, 32, 2

    key = jax.random.PRNGKey(0)
    key, xkey = jax.random.split(key)
    x = jax.random.normal(xkey, (batch, seq, n_features), dtype=jnp.float32)

    params = init_lstm_params(key, n_features, n_hidden, n_layers)
    packed = pack_lstm_params(params, n_features, n_hidden)

    output, (h_n, c_n) = build_lstm_forward(x, packed)
    jax.block_until_ready((output, h_n, c_n))

    assert output.shape == (batch, seq, n_hidden)
    assert h_n.shape == (n_layers, batch, n_hidden)
    assert c_n.shape == (n_layers, batch, n_hidden)

    # Numerical check against a pure-JAX reference of torch.nn.LSTM semantics.
    ref_out, (ref_h, ref_c) = _lstm_reference(x, params)
    assert jnp.allclose(output, ref_out, atol=1e-3, rtol=1e-3)
    assert jnp.allclose(h_n, ref_h, atol=1e-3, rtol=1e-3)
    assert jnp.allclose(c_n, ref_c, atol=1e-3, rtol=1e-3)

    print("KERNEL_OK")
</pallas_src>

<mosaic_0001>
module attributes {stable_mosaic.version = 11 : i64} {
  func.func @_fused_lstm_kernel(%arg0: memref<64x32xf32, #tpu.memory_space<vmem>>, %arg1: memref<2x32x128xf32, #tpu.memory_space<vmem>>, %arg2: memref<2x32x128xf32, #tpu.memory_space<vmem>>, %arg3: memref<2x1x128xf32, #tpu.memory_space<vmem>>, %arg4: memref<64x32xf32, #tpu.memory_space<vmem>>, %arg5: memref<2x8x32xf32, #tpu.memory_space<vmem>>, %arg6: memref<2x8x32xf32, #tpu.memory_space<vmem>>) attributes {dimension_semantics = [], scalar_prefetch = 0 : i64, scratch_operands = 0 : i64, tpu.core_type = #tpu.core_type<tc>} {
    %0 = tpu.iota {dimensions = array<i32: 1>} : vector<8x128xi32>
    %c64_i32 = arith.constant 64 : i32
    %1 = vector.broadcast %c64_i32 : i32 to vector<8x128xi32>
    %2 = arith.cmpi sge, %0, %1 : vector<8x128xi32>
    %c96_i32 = arith.constant 96 : i32
    %3 = vector.broadcast %c96_i32 : i32 to vector<8x128xi32>
    %4 = arith.cmpi slt, %0, %3 : vector<8x128xi32>
    %5 = arith.andi %2, %4 : vector<8x128xi1>
    %cst = arith.constant 1.000000e+00 : f32
    %cst_0 = arith.constant 5.000000e-01 : f32
    %6 = vector.broadcast %cst : f32 to vector<8x128xf32>
    %7 = vector.broadcast %cst_0 : f32 to vector<8x128xf32>
    %8 = arith.select %5, %6, %7 : vector<8x128xi1>, vector<8x128xf32>
    %c0 = arith.constant 0 : index
    %c0_1 = arith.constant 0 : index
    %c0_2 = arith.constant 0 : index
    %9 = vector.load %arg2[%c0, %c0_1, %c0_2] : memref<2x32x128xf32, #tpu.memory_space<vmem>>, vector<1x32x128xf32>
    %10 = vector.shape_cast %9 : vector<1x32x128xf32> to vector<32x128xf32>
    %c1 = arith.constant 1 : index
    %c0_3 = arith.constant 0 : index
    %c0_4 = arith.constant 0 : index
    %11 = vector.load %arg2[%c1, %c0_3, %c0_4] : memref<2x32x128xf32, #tpu.memory_space<vmem>>, vector<1x32x128xf32>
    %12 = vector.shape_cast %11 : vector<1x32x128xf32> to vector<32x128xf32>
    %c1_5 = arith.constant 1 : index
    %c0_6 = arith.constant 0 : index
    %c0_7 = arith.constant 0 : index
    %13 = vector.load %arg1[%c1_5, %c0_6, %c0_7] : memref<2x32x128xf32, #tpu.memory_space<vmem>>, vector<1x32x128xf32>
    %14 = vector.shape_cast %13 : vector<1x32x128xf32> to vector<32x128xf32>
    %c1_8 = arith.constant 1 : index
    %c0_9 = arith.constant 0 : index
    %c0_10 = arith.constant 0 : index
    %15 = vector.load %arg3[%c1_8, %c0_9, %c0_10] : memref<2x1x128xf32, #tpu.memory_space<vmem>>, vector<1x1x128xf32>
    %16 = vector.shape_cast %15 : vector<1x1x128xf32> to vector<1x128xf32>
    %17 = vector.shape_cast %16 : vector<1x128xf32> to vector<1x128xf32>
    %18 = vector.broadcast %17 : vector<1x128xf32> to vector<8x128xf32>
    %c0_11 = arith.constant 0 : index
    %c0_12 = arith.constant 0 : index
    %19 = vector.load %arg0[%c0_11, %c0_12] : memref<64x32xf32, #tpu.memory_space<vmem>>, vector<64x32xf32>
    %c0_13 = arith.constant 0 : index
    %c0_14 = arith.constant 0 : index
    %c0_15 = arith.constant 0 : index
    %20 = vector.load %arg1[%c0_13, %c0_14, %c0_15] : memref<2x32x128xf32, #tpu.memory_space<vmem>>, vector<1x32x128xf32>
    %21 = vector.shape_cast %20 : vector<1x32x128xf32> to vector<32x128xf32>
    %cst_16 = arith.constant dense<0.000000e+00> : vector<64x128xf32>
    %22 = tpu.matmul %19, %21, %cst_16 {dimension_numbers = #tpu.dot_dimension_numbers<[1], [0], [0], [1], [0, 0, 1, 1], [], []>} : vector<64x32xf32>, vector<32x128xf32>, vector<64x128xf32> -> vector<64x128xf32>
    %c0_17 = arith.constant 0 : index
    %c0_18 = arith.constant 0 : index
    %c0_19 = arith.constant 0 : index
    %23 = vector.load %arg3[%c0_17, %c0_18, %c0_19] : memref<2x1x128xf32, #tpu.memory_space<vmem>>, vector<1x1x128xf32>
    %24 = vector.shape_cast %23 : vector<1x1x128xf32> to vector<1x128xf32>
    %25 = vector.broadcast %24 : vector<1x128xf32> to vector<64x128xf32>
    %26 = arith.addf %22, %25 : vector<64x128xf32>
    %cst_20 = arith.constant 0.000000e+00 : f32
    %27 = vector.broadcast %cst_20 : f32 to vector<8x32xf32>
    %cst_21 = arith.constant 0.000000e+00 : f32
    %28 = vector.broadcast %cst_21 : f32 to vector<8x32xf32>
    %cst_22 = arith.constant 0.000000e+00 : f32
    %29 = vector.broadcast %cst_22 : f32 to vector<8x32xf32>
    %cst_23 = arith.constant 0.000000e+00 : f32
    %30 = vector.broadcast %cst_23 : f32 to vector<8x32xf32>
    %31 = vector.extract_strided_slice %26 {offsets = [0, 0], sizes = [8, 128], strides = [1, 1]} : vector<64x128xf32> to vector<8x128xf32>
    %cst_24 = arith.constant dense<0.000000e+00> : vector<8x128xf32>
    %32 = tpu.matmul %27, %10, %cst_24 {dimension_numbers = #tpu.dot_dimension_numbers<[1], [0], [0], [1], [0, 0, 1, 1], [], []>} : vector<8x32xf32>, vector<32x128xf32>, vector<8x128xf32> -> vector<8x128xf32>
    %33 = arith.addf %31, %32 : vector<8x128xf32>
    %34 = arith.mulf %33, %8 : vector<8x128xf32>
    %35 = math.tanh %34 : vector<8x128xf32>
    %36 = vector.extract_strided_slice %35 {offsets = [0, 0], sizes = [8, 32], strides = [1, 1]} : vector<8x128xf32> to vector<8x32xf32>
    %cst_25 = arith.constant 5.000000e-01 : f32
    %37 = vector.broadcast %cst_25 : f32 to vector<8x32xf32>
    %38 = arith.mulf %37, %36 : vector<8x32xf32>
    %cst_26 = arith.constant 5.000000e-01 : f32
    %39 = vector.broadcast %cst_26 : f32 to vector<8x32xf32>
    %40 = arith.addf %38, %39 : vector<8x32xf32>
    %41 = vector.extract_strided_slice %35 {offsets = [0, 32], sizes = [8, 32], strides = [1, 1]} : vector<8x128xf32> to vector<8x32xf32>
    %cst_27 = arith.constant 5.000000e-01 : f32
    %42 = vector.broadcast %cst_27 : f32 to vector<8x32xf32>
    %43 = arith.mulf %42, %41 : vector<8x32xf32>
    %cst_28 = arith.constant 5.000000e-01 : f32
    %44 = vector.broadcast %cst_28 : f32 to vector<8x32xf32>
    %45 = arith.addf %43, %44 : vector<8x32xf32>
    %46 = vector.extract_strided_slice %35 {offsets = [0, 64], sizes = [8, 32], strides = [1, 1]} : vector<8x128xf32> to vector<8x32xf32>
    %47 = vector.extract_strided_slice %35 {offsets = [0, 96], sizes = [8, 32], strides = [1, 1]} : vector<8x128xf32> to vector<8x32xf32>
    %cst_29 = arith.constant 5.000000e-01 : f32
    %48 = vector.broadcast %cst_29 : f32 to vector<8x32xf32>
    %49 = arith.mulf %48, %47 : vector<8x32xf32>
    %cst_30 = arith.constant 5.000000e-01 : f32
    %50 = vector.broadcast %cst_30 : f32 to vector<8x32xf32>
    %51 = arith.addf %49, %50 : vector<8x32xf32>
    %52 = arith.mulf %45, %29 : vector<8x32xf32>
    %53 = arith.mulf %40, %46 : vector<8x32xf32>
    %54 = arith.addf %52, %53 : vector<8x32xf32>
    %55 = math.tanh %54 : vector<8x32xf32>
    %56 = arith.mulf %51, %55 : vector<8x32xf32>
    %cst_31 = arith.constant dense<0.000000e+00> : vector<8x128xf32>
    %57 = tpu.matmul %56, %14, %cst_31 {dimension_numbers = #tpu.dot_dimension_numbers<[1], [0], [0], [1], [0, 0, 1, 1], [], []>} : vector<8x32xf32>, vector<32x128xf32>, vector<8x128xf32> -> vector<8x128xf32>
    %cst_32 = arith.constant dense<0.000000e+00> : vector<8x128xf32>
    %58 = tpu.matmul %28, %12, %cst_32 {dimension_numbers = #tpu.dot_dimension_numbers<[1], [0], [0], [1], [0, 0, 1, 1], [], []>} : vector<8x32xf32>, vector<32x128xf32>, vector<8x128xf32> -> vector<8x128xf32>
    %59 = arith.addf %57, %58 : vector<8x128xf32>
    %60 = arith.addf %59, %18 : vector<8x128xf32>
    %61 = arith.mulf %60, %8 : vector<8x128xf32>
    %62 = math.tanh %61 : vector<8x128xf32>
    %63 = vector.extract_strided_slice %62 {offsets = [0, 0], sizes = [8, 32], strides = [1, 1]} : vector<8x128xf32> to vector<8x32xf32>
    %cst_33 = arith.constant 5.000000e-01 : f32
    %64 = vector.broadcast %cst_33 : f32 to vector<8x32xf32>
    %65 = arith.mulf %64, %63 : vector<8x32xf32>
    %cst_34 = arith.constant 5.000000e-01 : f32
    %66 = vector.broadcast %cst_34 : f32 to vector<8x32xf32>
    %67 = arith.addf %65, %66 : vector<8x32xf32>
    %68 = vector.extract_strided_slice %62 {offsets = [0, 32], sizes = [8, 32], strides = [1, 1]} : vector<8x128xf32> to vector<8x32xf32>
    %cst_35 = arith.constant 5.000000e-01 : f32
    %69 = vector.broadcast %cst_35 : f32 to vector<8x32xf32>
    %70 = arith.mulf %69, %68 : vector<8x32xf32>
    %cst_36 = arith.constant 5.000000e-01 : f32
    %71 = vector.broadcast %cst_36 : f32 to vector<8x32xf32>
    %72 = arith.addf %70, %71 : vector<8x32xf32>
    %73 = vector.extract_strided_slice %62 {offsets = [0, 64], sizes = [8, 32], strides = [1, 1]} : vector<8x128xf32> to vector<8x32xf32>
    %74 = vector.extract_strided_slice %62 {offsets = [0, 96], sizes = [8, 32], strides = [1, 1]} : vector<8x128xf32> to vector<8x32xf32>
    %cst_37 = arith.constant 5.000000e-01 : f32
    %75 = vector.broadcast %cst_37 : f32 to vector<8x32xf32>
    %76 = arith.mulf %75, %74 : vector<8x32xf32>
    %cst_38 = arith.constant 5.000000e-01 : f32
    %77 = vector.broadcast %cst_38 : f32 to vector<8x32xf32>
    %78 = arith.addf %76, %77 : vector<8x32xf32>
    %79 = arith.mulf %72, %30 : vector<8x32xf32>
    %80 = arith.mulf %67, %73 : vector<8x32xf32>
    %81 = arith.addf %79, %80 : vector<8x32xf32>
    %82 = math.tanh %81 : vector<8x32xf32>
    %83 = arith.mulf %78, %82 : vector<8x32xf32>
    %c0_39 = arith.constant 0 : index
    %c0_40 = arith.constant 0 : index
    %84 = vector.load %arg4[%c0_39, %c0_40] : memref<64x32xf32, #tpu.memory_space<vmem>>, vector<8x32xf32>
    tpu.vector_store %arg4[%c0_39, %c0_40], %83 {strides = array<i32>} : memref<64x32xf32, #tpu.memory_space<vmem>>, vector<8x32xf32>,
    %85 = vector.extract_strided_slice %26 {offsets = [8, 0], sizes = [8, 128], strides = [1, 1]} : vector<64x128xf32> to vector<8x128xf32>
    %cst_41 = arith.constant dense<0.000000e+00> : vector<8x128xf32>
    %86 = tpu.matmul %56, %10, %cst_41 {dimension_numbers = #tpu.dot_dimension_numbers<[1], [0], [0], [1], [0, 0, 1, 1], [], []>} : vector<8x32xf32>, vector<32x128xf32>, vector<8x128xf32> -> vector<8x128xf32>
    %87 = arith.addf %85, %86 : vector<8x128xf32>
    %88 = arith.mulf %87, %8 : vector<8x128xf32>
    %89 = math.tanh %88 : vector<8x128xf32>
    %90 = vector.extract_strided_slice %89 {offsets = [0, 0], sizes = [8, 32], strides = [1, 1]} : vector<8x128xf32> to vector<8x32xf32>
    %cst_42 = arith.constant 5.000000e-01 : f32
    %91 = vector.broadcast %cst_42 : f32 to vector<8x32xf32>
    %92 = arith.mulf %91, %90 : vector<8x32xf32>
    %cst_43 = arith.constant 5.000000e-01 : f32
    %93 = vector.broadcast %cst_43 : f32 to vector<8x32xf32>
    %94 = arith.addf %92, %93 : vector<8x32xf32>
    %95 = vector.extract_strided_slice %89 {offsets = [0, 32], sizes = [8, 32], strides = [1, 1]} : vector<8x128xf32> to vector<8x32xf32>
    %cst_44 = arith.constant 5.000000e-01 : f32
    %96 = vector.broadcast %cst_44 : f32 to vector<8x32xf32>
    %97 = arith.mulf %96, %95 : vector<8x32xf32>
    %cst_45 = arith.constant 5.000000e-01 : f32
    %98 = vector.broadcast %cst_45 : f32 to vector<8x32xf32>
    %99 = arith.addf %97, %98 : vector<8x32xf32>
    %100 = vector.extract_strided_slice %89 {offsets = [0, 64], sizes = [8, 32], strides = [1, 1]} : vector<8x128xf32> to vector<8x32xf32>
    %101 = vector.extract_strided_slice %89 {offsets = [0, 96], sizes = [8, 32], strides = [1, 1]} : vector<8x128xf32> to vector<8x32xf32>
    %cst_46 = arith.constant 5.000000e-01 : f32
    %102 = vector.broadcast %cst_46 : f32 to vector<8x32xf32>
    %103 = arith.mulf %102, %101 : vector<8x32xf32>
    %cst_47 = arith.constant 5.000000e-01 : f32
    %104 = vector.broadcast %cst_47 : f32 to vector<8x32xf32>
    %105 = arith.addf %103, %104 : vector<8x32xf32>
    %106 = arith.mulf %99, %54 : vector<8x32xf32>
    %107 = arith.mulf %94, %100 : vector<8x32xf32>
    %108 = arith.addf %106, %107 : vector<8x32xf32>
    %109 = math.tanh %108 : vector<8x32xf32>
    %110 = arith.mulf %105, %109 : vector<8x32xf32>
    %cst_48 = arith.constant dense<0.000000e+00> : vector<8x128xf32>
    %111 = tpu.matmul %110, %14, %cst_48 {dimension_numbers = #tpu.dot_dimension_numbers<[1], [0], [0], [1], [0, 0, 1, 1], [], []>} : vector<8x32xf32>, vector<32x128xf32>, vector<8x128xf32> -> vector<8x128xf32>
    %cst_49 = arith.constant dense<0.000000e+00> : vector<8x128xf32>
    %112 = tpu.matmul %83, %12, %cst_49 {dimension_numbers = #tpu.dot_dimension_numbers<[1], [0], [0], [1], [0, 0, 1, 1], [], []>} : vector<8x32xf32>, vector<32x128xf32>, vector<8x128xf32> -> vector<8x128xf32>
    %113 = arith.addf %111, %112 : vector<8x128xf32>
    %114 = arith.addf %113, %18 : vector<8x128xf32>
    %115 = arith.mulf %114, %8 : vector<8x128xf32>
    %116 = math.tanh %115 : vector<8x128xf32>
    %117 = vector.extract_strided_slice %116 {offsets = [0, 0], sizes = [8, 32], strides = [1, 1]} : vector<8x128xf32> to vector<8x32xf32>
    %cst_50 = arith.constant 5.000000e-01 : f32
    %118 = vector.broadcast %cst_50 : f32 to vector<8x32xf32>
    %119 = arith.mulf %118, %117 : vector<8x32xf32>
    %cst_51 = arith.constant 5.000000e-01 : f32
    %120 = vector.broadcast %cst_51 : f32 to vector<8x32xf32>
    %121 = arith.addf %119, %120 : vector<8x32xf32>
    %122 = vector.extract_strided_slice %116 {offsets = [0, 32], sizes = [8, 32], strides = [1, 1]} : vector<8x128xf32> to vector<8x32xf32>
    %cst_52 = arith.constant 5.000000e-01 : f32
    %123 = vector.broadcast %cst_52 : f32 to vector<8x32xf32>
    %124 = arith.mulf %123, %122 : vector<8x32xf32>
    %cst_53 = arith.constant 5.000000e-01 : f32
    %125 = vector.broadcast %cst_53 : f32 to vector<8x32xf32>
    %126 = arith.addf %124, %125 : vector<8x32xf32>
    %127 = vector.extract_strided_slice %116 {offsets = [0, 64], sizes = [8, 32], strides = [1, 1]} : vector<8x128xf32> to vector<8x32xf32>
    %128 = vector.extract_strided_slice %116 {offsets = [0, 96], sizes = [8, 32], strides = [1, 1]} : vector<8x128xf32> to vector<8x32xf32>
    %cst_54 = arith.constant 5.000000e-01 : f32
    %129 = vector.broadcast %cst_54 : f32 to vector<8x32xf32>
    %130 = arith.mulf %129, %128 : vector<8x32xf32>
    %cst_55 = arith.constant 5.000000e-01 : f32
    %131 = vector.broadcast %cst_55 : f32 to vector<8x32xf32>
    %132 = arith.addf %130, %131 : vector<8x32xf32>
    %133 = arith.mulf %126, %81 : vector<8x32xf32>
    %134 = arith.mulf %121, %127 : vector<8x32xf32>
    %135 = arith.addf %133, %134 : vector<8x32xf32>
    %136 = math.tanh %135 : vector<8x32xf32>
    %137 = arith.mulf %132, %136 : vector<8x32xf32>
    %c8 = arith.constant 8 : index
    %c0_56 = arith.constant 0 : index
    %138 = vector.load %arg4[%c8, %c0_56] : memref<64x32xf32, #tpu.memory_space<vmem>>, vector<8x32xf32>
    tpu.vector_store %arg4[%c8, %c0_56], %137 {strides = array<i32>} : memref<64x32xf32, #tpu.memory_space<vmem>>, vector<8x32xf32>,
    %139 = vector.extract_strided_slice %26 {offsets = [16, 0], sizes = [8, 128], strides = [1, 1]} : vector<64x128xf32> to vector<8x128xf32>
    %cst_57 = arith.constant dense<0.000000e+00> : vector<8x128xf32>
    %140 = tpu.matmul %110, %10, %cst_57 {dimension_numbers = #tpu.dot_dimension_numbers<[1], [0], [0], [1], [0, 0, 1, 1], [], []>} : vector<8x32xf32>, vector<32x128xf32>, vector<8x128xf32> -> vector<8x128xf32>
    %141 = arith.addf %139, %140 : vector<8x128xf32>
    %142 = arith.mulf %141, %8 : vector<8x128xf32>
    %143 = math.tanh %142 : vector<8x128xf32>
    %144 = vector.extract_strided_slice %143 {offsets = [0, 0], sizes = [8, 32], strides = [1, 1]} : vector<8x128xf32> to vector<8x32xf32>
    %cst_58 = arith.constant 5.000000e-01 : f32
    %145 = vector.broadcast %cst_58 : f32 to vector<8x32xf32>
    %146 = arith.mulf %145, %144 : vector<8x32xf32>
    %cst_59 = arith.constant 5.000000e-01 : f32
    %147 = vector.broadcast %cst_59 : f32 to vector<8x32xf32>
    %148 = arith.addf %146, %147 : vector<8x32xf32>
    %149 = vector.extract_strided_slice %143 {offsets = [0, 32], sizes = [8, 32], strides = [1, 1]} : vector<8x128xf32> to vector<8x32xf32>
    %cst_60 = arith.constant 5.000000e-01 : f32
    %150 = vector.broadcast %cst_60 : f32 to vector<8x32xf32>
    %151 = arith.mulf %150, %149 : vector<8x32xf32>
    %cst_61 = arith.constant 5.000000e-01 : f32
    %152 = vector.broadcast %cst_61 : f32 to vector<8x32xf32>
    %153 = arith.addf %151, %152 : vector<8x32xf32>
    %154 = vector.extract_strided_slice %143 {offsets = [0, 64], sizes = [8, 32], strides = [1, 1]} : vector<8x128xf32> to vector<8x32xf32>
    %155 = vector.extract_strided_slice %143 {offsets = [0, 96], sizes = [8, 32], strides = [1, 1]} : vector<8x128xf32> to vector<8x32xf32>
    %cst_62 = arith.constant 5.000000e-01 : f32
    %156 = vector.broadcast %cst_62 : f32 to vector<8x32xf32>
    %157 = arith.mulf %156, %155 : vector<8x32xf32>
    %cst_63 = arith.constant 5.000000e-01 : f32
    %158 = vector.broadcast %cst_63 : f32 to vector<8x32xf32>
    %159 = arith.addf %157, %158 : vector<8x32xf32>
    %160 = arith.mulf %153, %108 : vector<8x32xf32>
    %161 = arith.mulf %148, %154 : vector<8x32xf32>
    %162 = arith.addf %160, %161 : vector<8x32xf32>
    %163 = math.tanh %162 : vector<8x32xf32>
    %164 = arith.mulf %159, %163 : vector<8x32xf32>
    %cst_64 = arith.constant dense<0.000000e+00> : vector<8x128xf32>
    %165 = tpu.matmul %164, %14, %cst_64 {dimension_numbers = #tpu.dot_dimension_numbers<[1], [0], [0], [1], [0, 0, 1, 1], [], []>} : vector<8x32xf32>, vector<32x128xf32>, vector<8x128xf32> -> vector<8x128xf32>
    %cst_65 = arith.constant dense<0.000000e+00> : vector<8x128xf32>
    %166 = tpu.matmul %137, %12, %cst_65 {dimension_numbers = #tpu.dot_dimension_numbers<[1], [0], [0], [1], [0, 0, 1, 1], [], []>} : vector<8x32xf32>, vector<32x128xf32>, vector<8x128xf32> -> vector<8x128xf32>
    %167 = arith.addf %165, %166 : vector<8x128xf32>
    %168 = arith.addf %167, %18 : vector<8x128xf32>
    %169 = arith.mulf %168, %8 : vector<8x128xf32>
    %170 = math.tanh %169 : vector<8x128xf32>
    %171 = vector.extract_strided_slice %170 {offsets = [0, 0], sizes = [8, 32], strides = [1, 1]} : vector<8x128xf32> to vector<8x32xf32>
    %cst_66 = arith.constant 5.000000e-01 : f32
    %172 = vector.broadcast %cst_66 : f32 to vector<8x32xf32>
    %173 = arith.mulf %172, %171 : vector<8x32xf32>
    %cst_67 = arith.constant 5.000000e-01 : f32
    %174 = vector.broadcast %cst_67 : f32 to vector<8x32xf32>
    %175 = arith.addf %173, %174 : vector<8x32xf32>
    %176 = vector.extract_strided_slice %170 {offsets = [0, 32], sizes = [8, 32], strides = [1, 1]} : vector<8x128xf32> to vector<8x32xf32>
    %cst_68 = arith.constant 5.000000e-01 : f32
    %177 = vector.broadcast %cst_68 : f32 to vector<8x32xf32>
    %178 = arith.mulf %177, %176 : vector<8x32xf32>
    %cst_69 = arith.constant 5.000000e-01 : f32
    %179 = vector.broadcast %cst_69 : f32 to vector<8x32xf32>
    %180 = arith.addf %178, %179 : vector<8x32xf32>
    %181 = vector.extract_strided_slice %170 {offsets = [0, 64], sizes = [8, 32], strides = [1, 1]} : vector<8x128xf32> to vector<8x32xf32>
    %182 = vector.extract_strided_slice %170 {offsets = [0, 96], sizes = [8, 32], strides = [1, 1]} : vector<8x128xf32> to vector<8x32xf32>
    %cst_70 = arith.constant 5.000000e-01 : f32
    %183 = vector.broadcast %cst_70 : f32 to vector<8x32xf32>
    %184 = arith.mulf %183, %182 : vector<8x32xf32>
    %cst_71 = arith.constant 5.000000e-01 : f32
    %185 = vector.broadcast %cst_71 : f32 to vector<8x32xf32>
    %186 = arith.addf %184, %185 : vector<8x32xf32>
    %187 = arith.mulf %180, %135 : vector<8x32xf32>
    %188 = arith.mulf %175, %181 : vector<8x32xf32>
    %189 = arith.addf %187, %188 : vector<8x32xf32>
    %190 = math.tanh %189 : vector<8x32xf32>
    %191 = arith.mulf %186, %190 : vector<8x32xf32>
    %c16 = arith.constant 16 : index
    %c0_72 = arith.constant 0 : index
    %192 = vector.load %arg4[%c16, %c0_72] : memref<64x32xf32, #tpu.memory_space<vmem>>, vector<8x32xf32>
    tpu.vector_store %arg4[%c16, %c0_72], %191 {strides = array<i32>} : memref<64x32xf32, #tpu.memory_space<vmem>>, vector<8x32xf32>,
    %193 = vector.extract_strided_slice %26 {offsets = [24, 0], sizes = [8, 128], strides = [1, 1]} : vector<64x128xf32> to vector<8x128xf32>
    %cst_73 = arith.constant dense<0.000000e+00> : vector<8x128xf32>
    %194 = tpu.matmul %164, %10, %cst_73 {dimension_numbers = #tpu.dot_dimension_numbers<[1], [0], [0], [1], [0, 0, 1, 1], [], []>} : vector<8x32xf32>, vector<32x128xf32>, vector<8x128xf32> -> vector<8x128xf32>
    %195 = arith.addf %193, %194 : vector<8x128xf32>
    %196 = arith.mulf %195, %8 : vector<8x128xf32>
    %197 = math.tanh %196 : vector<8x128xf32>
    %198 = vector.extract_strided_slice %197 {offsets = [0, 0], sizes = [8, 32], strides = [1, 1]} : vector<8x128xf32> to vector<8x32xf32>
    %cst_74 = arith.constant 5.000000e-01 : f32
    %199 = vector.broadcast %cst_74 : f32 to vector<8x32xf32>
    %200 = arith.mulf %199, %198 : vector<8x32xf32>
    %cst_75 = arith.constant 5.000000e-01 : f32
    %201 = vector.broadcast %cst_75 : f32 to vector<8x32xf32>
    %202 = arith.addf %200, %201 : vector<8x32xf32>
    %203 = vector.extract_strided_slice %197 {offsets = [0, 32], sizes = [8, 32], strides = [1, 1]} : vector<8x128xf32> to vector<8x32xf32>
    %cst_76 = arith.constant 5.000000e-01 : f32
    %204 = vector.broadcast %cst_76 : f32 to vector<8x32xf32>
    %205 = arith.mulf %204, %203 : vector<8x32xf32>
    %cst_77 = arith.constant 5.000000e-01 : f32
    %206 = vector.broadcast %cst_77 : f32 to vector<8x32xf32>
    %207 = arith.addf %205, %206 : vector<8x32xf32>
    %208 = vector.extract_strided_slice %197 {offsets = [0, 64], sizes = [8, 32], strides = [1, 1]} : vector<8x128xf32> to vector<8x32xf32>
    %209 = vector.extract_strided_slice %197 {offsets = [0, 96], sizes = [8, 32], strides = [1, 1]} : vector<8x128xf32> to vector<8x32xf32>
    %cst_78 = arith.constant 5.000000e-01 : f32
    %210 = vector.broadcast %cst_78 : f32 to vector<8x32xf32>
    %211 = arith.mulf %210, %209 : vector<8x32xf32>
    %cst_79 = arith.constant 5.000000e-01 : f32
    %212 = vector.broadcast %cst_79 : f32 to vector<8x32xf32>
    %213 = arith.addf %211, %212 : vector<8x32xf32>
    %214 = arith.mulf %207, %162 : vector<8x32xf32>
    %215 = arith.mulf %202, %208 : vector<8x32xf32>
    %216 = arith.addf %214, %215 : vector<8x32xf32>
    %217 = math.tanh %216 : vector<8x32xf32>
    %218 = arith.mulf %213, %217 : vector<8x32xf32>
    %cst_80 = arith.constant dense<0.000000e+00> : vector<8x128xf32>
    %219 = tpu.matmul %218, %14, %cst_80 {dimension_numbers = #tpu.dot_dimension_numbers<[1], [0], [0], [1], [0, 0, 1, 1], [], []>} : vector<8x32xf32>, vector<32x128xf32>, vector<8x128xf32> -> vector<8x128xf32>
    %cst_81 = arith.constant dense<0.000000e+00> : vector<8x128xf32>
    %220 = tpu.matmul %191, %12, %cst_81 {dimension_numbers = #tpu.dot_dimension_numbers<[1], [0], [0], [1], [0, 0, 1, 1], [], []>} : vector<8x32xf32>, vector<32x128xf32>, vector<8x128xf32> -> vector<8x128xf32>
    %221 = arith.addf %219, %220 : vector<8x128xf32>
    %222 = arith.addf %221, %18 : vector<8x128xf32>
    %223 = arith.mulf %222, %8 : vector<8x128xf32>
    %224 = math.tanh %223 : vector<8x128xf32>
    %225 = vector.extract_strided_slice %224 {offsets = [0, 0], sizes = [8, 32], strides = [1, 1]} : vector<8x128xf32> to vector<8x32xf32>
    %cst_82 = arith.constant 5.000000e-01 : f32
    %226 = vector.broadcast %cst_82 : f32 to vector<8x32xf32>
    %227 = arith.mulf %226, %225 : vector<8x32xf32>
    %cst_83 = arith.constant 5.000000e-01 : f32
    %228 = vector.broadcast %cst_83 : f32 to vector<8x32xf32>
    %229 = arith.addf %227, %228 : vector<8x32xf32>
    %230 = vector.extract_strided_slice %224 {offsets = [0, 32], sizes = [8, 32], strides = [1, 1]} : vector<8x128xf32> to vector<8x32xf32>
    %cst_84 = arith.constant 5.000000e-01 : f32
    %231 = vector.broadcast %cst_84 : f32 to vector<8x32xf32>
    %232 = arith.mulf %231, %230 : vector<8x32xf32>
    %cst_85 = arith.constant 5.000000e-01 : f32
    %233 = vector.broadcast %cst_85 : f32 to vector<8x32xf32>
    %234 = arith.addf %232, %233 : vector<8x32xf32>
    %235 = vector.extract_strided_slice %224 {offsets = [0, 64], sizes = [8, 32], strides = [1, 1]} : vector<8x128xf32> to vector<8x32xf32>
    %236 = vector.extract_strided_slice %224 {offsets = [0, 96], sizes = [8, 32], strides = [1, 1]} : vector<8x128xf32> to vector<8x32xf32>
    %cst_86 = arith.constant 5.000000e-01 : f32
    %237 = vector.broadcast %cst_86 : f32 to vector<8x32xf32>
    %238 = arith.mulf %237, %236 : vector<8x32xf32>
    %cst_87 = arith.constant 5.000000e-01 : f32
    %239 = vector.broadcast %cst_87 : f32 to vector<8x32xf32>
    %240 = arith.addf %238, %239 : vector<8x32xf32>
    %241 = arith.mulf %234, %189 : vector<8x32xf32>
    %242 = arith.mulf %229, %235 : vector<8x32xf32>
    %243 = arith.addf %241, %242 : vector<8x32xf32>
    %244 = math.tanh %243 : vector<8x32xf32>
    %245 = arith.mulf %240, %244 : vector<8x32xf32>
    %c24 = arith.constant 24 : index
    %c0_88 = arith.constant 0 : index
    %246 = vector.load %arg4[%c24, %c0_88] : memref<64x32xf32, #tpu.memory_space<vmem>>, vector<8x32xf32>
    tpu.vector_store %arg4[%c24, %c0_88], %245 {strides = array<i32>} : memref<64x32xf32, #tpu.memory_space<vmem>>, vector<8x32xf32>,
    %247 = vector.extract_strided_slice %26 {offsets = [32, 0], sizes = [8, 128], strides = [1, 1]} : vector<64x128xf32> to vector<8x128xf32>
    %cst_89 = arith.constant dense<0.000000e+00> : vector<8x128xf32>
    %248 = tpu.matmul %218, %10, %cst_89 {dimension_numbers = #tpu.dot_dimension_numbers<[1], [0], [0], [1], [0, 0, 1, 1], [], []>} : vector<8x32xf32>, vector<32x128xf32>, vector<8x128xf32> -> vector<8x128xf32>
    %249 = arith.addf %247, %248 : vector<8x128xf32>
    %250 = arith.mulf %249, %8 : vector<8x128xf32>
    %251 = math.tanh %250 : vector<8x128xf32>
    %252 = vector.extract_strided_slice %251 {offsets = [0, 0], sizes = [8, 32], strides = [1, 1]} : vector<8x128xf32> to vector<8x32xf32>
    %cst_90 = arith.constant 5.000000e-01 : f32
    %253 = vector.broadcast %cst_90 : f32 to vector<8x32xf32>
    %254 = arith.mulf %253, %252 : vector<8x32xf32>
    %cst_91 = arith.constant 5.000000e-01 : f32
    %255 = vector.broadcast %cst_91 : f32 to vector<8x32xf32>
    %256 = arith.addf %254, %255 : vector<8x32xf32>
    %257 = vector.extract_strided_slice %251 {offsets = [0, 32], sizes = [8, 32], strides = [1, 1]} : vector<8x128xf32> to vector<8x32xf32>
    %cst_92 = arith.constant 5.000000e-01 : f32
    %258 = vector.broadcast %cst_92 : f32 to vector<8x32xf32>
    %259 = arith.mulf %258, %257 : vector<8x32xf32>
    %cst_93 = arith.constant 5.000000e-01 : f32
    %260 = vector.broadcast %cst_93 : f32 to vector<8x32xf32>
    %261 = arith.addf %259, %260 : vector<8x32xf32>
    %262 = vector.extract_strided_slice %251 {offsets = [0, 64], sizes = [8, 32], strides = [1, 1]} : vector<8x128xf32> to vector<8x32xf32>
    %263 = vector.extract_strided_slice %251 {offsets = [0, 96], sizes = [8, 32], strides = [1, 1]} : vector<8x128xf32> to vector<8x32xf32>
    %cst_94 = arith.constant 5.000000e-01 : f32
    %264 = vector.broadcast %cst_94 : f32 to vector<8x32xf32>
    %265 = arith.mulf %264, %263 : vector<8x32xf32>
    %cst_95 = arith.constant 5.000000e-01 : f32
    %266 = vector.broadcast %cst_95 : f32 to vector<8x32xf32>
    %267 = arith.addf %265, %266 : vector<8x32xf32>
    %268 = arith.mulf %261, %216 : vector<8x32xf32>
    %269 = arith.mulf %256, %262 : vector<8x32xf32>
    %270 = arith.addf %268, %269 : vector<8x32xf32>
    %271 = math.tanh %270 : vector<8x32xf32>
    %272 = arith.mulf %267, %271 : vector<8x32xf32>
    %cst_96 = arith.constant dense<0.000000e+00> : vector<8x128xf32>
    %273 = tpu.matmul %272, %14, %cst_96 {dimension_numbers = #tpu.dot_dimension_numbers<[1], [0], [0], [1], [0, 0, 1, 1], [], []>} : vector<8x32xf32>, vector<32x128xf32>, vector<8x128xf32> -> vector<8x128xf32>
    %cst_97 = arith.constant dense<0.000000e+00> : vector<8x128xf32>
    %274 = tpu.matmul %245, %12, %cst_97 {dimension_numbers = #tpu.dot_dimension_numbers<[1], [0], [0], [1], [0, 0, 1, 1], [], []>} : vector<8x32xf32>, vector<32x128xf32>, vector<8x128xf32> -> vector<8x128xf32>
    %275 = arith.addf %273, %274 : vector<8x128xf32>
    %276 = arith.addf %275, %18 : vector<8x128xf32>
    %277 = arith.mulf %276, %8 : vector<8x128xf32>
    %278 = math.tanh %277 : vector<8x128xf32>
    %279 = vector.extract_strided_slice %278 {offsets = [0, 0], sizes = [8, 32], strides = [1, 1]} : vector<8x128xf32> to vector<8x32xf32>
    %cst_98 = arith.constant 5.000000e-01 : f32
    %280 = vector.broadcast %cst_98 : f32 to vector<8x32xf32>
    %281 = arith.mulf %280, %279 : vector<8x32xf32>
    %cst_99 = arith.constant 5.000000e-01 : f32
    %282 = vector.broadcast %cst_99 : f32 to vector<8x32xf32>
    %283 = arith.addf %281, %282 : vector<8x32xf32>
    %284 = vector.extract_strided_slice %278 {offsets = [0, 32], sizes = [8, 32], strides = [1, 1]} : vector<8x128xf32> to vector<8x32xf32>
    %cst_100 = arith.constant 5.000000e-01 : f32
    %285 = vector.broadcast %cst_100 : f32 to vector<8x32xf32>
    %286 = arith.mulf %285, %284 : vector<8x32xf32>
    %cst_101 = arith.constant 5.000000e-01 : f32
    %287 = vector.broadcast %cst_101 : f32 to vector<8x32xf32>
    %288 = arith.addf %286, %287 : vector<8x32xf32>
    %289 = vector.extract_strided_slice %278 {offsets = [0, 64], sizes = [8, 32], strides = [1, 1]} : vector<8x128xf32> to vector<8x32xf32>
    %290 = vector.extract_strided_slice %278 {offsets = [0, 96], sizes = [8, 32], strides = [1, 1]} : vector<8x128xf32> to vector<8x32xf32>
    %cst_102 = arith.constant 5.000000e-01 : f32
    %291 = vector.broadcast %cst_102 : f32 to vector<8x32xf32>
    %292 = arith.mulf %291, %290 : vector<8x32xf32>
    %cst_103 = arith.constant 5.000000e-01 : f32
    %293 = vector.broadcast %cst_103 : f32 to vector<8x32xf32>
    %294 = arith.addf %292, %293 : vector<8x32xf32>
    %295 = arith.mulf %288, %243 : vector<8x32xf32>
    %296 = arith.mulf %283, %289 : vector<8x32xf32>
    %297 = arith.addf %295, %296 : vector<8x32xf32>
    %298 = math.tanh %297 : vector<8x32xf32>
    %299 = arith.mulf %294, %298 : vector<8x32xf32>
    %c32 = arith.constant 32 : index
    %c0_104 = arith.constant 0 : index
    %300 = vector.load %arg4[%c32, %c0_104] : memref<64x32xf32, #tpu.memory_space<vmem>>, vector<8x32xf32>
    tpu.vector_store %arg4[%c32, %c0_104], %299 {strides = array<i32>} : memref<64x32xf32, #tpu.memory_space<vmem>>, vector<8x32xf32>,
    %301 = vector.extract_strided_slice %26 {offsets = [40, 0], sizes = [8, 128], strides = [1, 1]} : vector<64x128xf32> to vector<8x128xf32>
    %cst_105 = arith.constant dense<0.000000e+00> : vector<8x128xf32>
    %302 = tpu.matmul %272, %10, %cst_105 {dimension_numbers = #tpu.dot_dimension_numbers<[1], [0], [0], [1], [0, 0, 1, 1], [], []>} : vector<8x32xf32>, vector<32x128xf32>, vector<8x128xf32> -> vector<8x128xf32>
    %303 = arith.addf %301, %302 : vector<8x128xf32>
    %304 = arith.mulf %303, %8 : vector<8x128xf32>
    %305 = math.tanh %304 : vector<8x128xf32>
    %306 = vector.extract_strided_slice %305 {offsets = [0, 0], sizes = [8, 32], strides = [1, 1]} : vector<8x128xf32> to vector<8x32xf32>
    %cst_106 = arith.constant 5.000000e-01 : f32
    %307 = vector.broadcast %cst_106 : f32 to vector<8x32xf32>
    %308 = arith.mulf %307, %306 : vector<8x32xf32>
    %cst_107 = arith.constant 5.000000e-01 : f32
    %309 = vector.broadcast %cst_107 : f32 to vector<8x32xf32>
    %310 = arith.addf %308, %309 : vector<8x32xf32>
    %311 = vector.extract_strided_slice %305 {offsets = [0, 32], sizes = [8, 32], strides = [1, 1]} : vector<8x128xf32> to vector<8x32xf32>
    %cst_108 = arith.constant 5.000000e-01 : f32
    %312 = vector.broadcast %cst_108 : f32 to vector<8x32xf32>
    %313 = arith.mulf %312, %311 : vector<8x32xf32>
    %cst_109 = arith.constant 5.000000e-01 : f32
    %314 = vector.broadcast %cst_109 : f32 to vector<8x32xf32>
    %315 = arith.addf %313, %314 : vector<8x32xf32>
    %316 = vector.extract_strided_slice %305 {offsets = [0, 64], sizes = [8, 32], strides = [1, 1]} : vector<8x128xf32> to vector<8x32xf32>
    %317 = vector.extract_strided_slice %305 {offsets = [0, 96], sizes = [8, 32], strides = [1, 1]} : vector<8x128xf32> to vector<8x32xf32>
    %cst_110 = arith.constant 5.000000e-01 : f32
    %318 = vector.broadcast %cst_110 : f32 to vector<8x32xf32>
    %319 = arith.mulf %318, %317 : vector<8x32xf32>
    %cst_111 = arith.constant 5.000000e-01 : f32
    %320 = vector.broadcast %cst_111 : f32 to vector<8x32xf32>
    %321 = arith.addf %319, %320 : vector<8x32xf32>
    %322 = arith.mulf %315, %270 : vector<8x32xf32>
    %323 = arith.mulf %310, %316 : vector<8x32xf32>
    %324 = arith.addf %322, %323 : vector<8x32xf32>
    %325 = math.tanh %324 : vector<8x32xf32>
    %326 = arith.mulf %321, %325 : vector<8x32xf32>
    %cst_112 = arith.constant dense<0.000000e+00> : vector<8x128xf32>
    %327 = tpu.matmul %326, %14, %cst_112 {dimension_numbers = #tpu.dot_dimension_numbers<[1], [0], [0], [1], [0, 0, 1, 1], [], []>} : vector<8x32xf32>, vector<32x128xf32>, vector<8x128xf32> -> vector<8x128xf32>
    %cst_113 = arith.constant dense<0.000000e+00> : vector<8x128xf32>
    %328 = tpu.matmul %299, %12, %cst_113 {dimension_numbers = #tpu.dot_dimension_numbers<[1], [0], [0], [1], [0, 0, 1, 1], [], []>} : vector<8x32xf32>, vector<32x128xf32>, vector<8x128xf32> -> vector<8x128xf32>
    %329 = arith.addf %327, %328 : vector<8x128xf32>
    %330 = arith.addf %329, %18 : vector<8x128xf32>
    %331 = arith.mulf %330, %8 : vector<8x128xf32>
    %332 = math.tanh %331 : vector<8x128xf32>
    %333 = vector.extract_strided_slice %332 {offsets = [0, 0], sizes = [8, 32], strides = [1, 1]} : vector<8x128xf32> to vector<8x32xf32>
    %cst_114 = arith.constant 5.000000e-01 : f32
    %334 = vector.broadcast %cst_114 : f32 to vector<8x32xf32>
    %335 = arith.mulf %334, %333 : vector<8x32xf32>
    %cst_115 = arith.constant 5.000000e-01 : f32
    %336 = vector.broadcast %cst_115 : f32 to vector<8x32xf32>
    %337 = arith.addf %335, %336 : vector<8x32xf32>
    %338 = vector.extract_strided_slice %332 {offsets = [0, 32], sizes = [8, 32], strides = [1, 1]} : vector<8x128xf32> to vector<8x32xf32>
    %cst_116 = arith.constant 5.000000e-01 : f32
    %339 = vector.broadcast %cst_116 : f32 to vector<8x32xf32>
    %340 = arith.mulf %339, %338 : vector<8x32xf32>
    %cst_117 = arith.constant 5.000000e-01 : f32
    %341 = vector.broadcast %cst_117 : f32 to vector<8x32xf32>
    %342 = arith.addf %340, %341 : vector<8x32xf32>
    %343 = vector.extract_strided_slice %332 {offsets = [0, 64], sizes = [8, 32], strides = [1, 1]} : vector<8x128xf32> to vector<8x32xf32>
    %344 = vector.extract_strided_slice %332 {offsets = [0, 96], sizes = [8, 32], strides = [1, 1]} : vector<8x128xf32> to vector<8x32xf32>
    %cst_118 = arith.constant 5.000000e-01 : f32
    %345 = vector.broadcast %cst_118 : f32 to vector<8x32xf32>
    %346 = arith.mulf %345, %344 : vector<8x32xf32>
    %cst_119 = arith.constant 5.000000e-01 : f32
    %347 = vector.broadcast %cst_119 : f32 to vector<8x32xf32>
    %348 = arith.addf %346, %347 : vector<8x32xf32>
    %349 = arith.mulf %342, %297 : vector<8x32xf32>
    %350 = arith.mulf %337, %343 : vector<8x32xf32>
    %351 = arith.addf %349, %350 : vector<8x32xf32>
    %352 = math.tanh %351 : vector<8x32xf32>
    %353 = arith.mulf %348, %352 : vector<8x32xf32>
    %c40 = arith.constant 40 : index
    %c0_120 = arith.constant 0 : index
    %354 = vector.load %arg4[%c40, %c0_120] : memref<64x32xf32, #tpu.memory_space<vmem>>, vector<8x32xf32>
    tpu.vector_store %arg4[%c40, %c0_120], %353 {strides = array<i32>} : memref<64x32xf32, #tpu.memory_space<vmem>>, vector<8x32xf32>,
    %355 = vector.extract_strided_slice %26 {offsets = [48, 0], sizes = [8, 128], strides = [1, 1]} : vector<64x128xf32> to vector<8x128xf32>
    %cst_121 = arith.constant dense<0.000000e+00> : vector<8x128xf32>
    %356 = tpu.matmul %326, %10, %cst_121 {dimension_numbers = #tpu.dot_dimension_numbers<[1], [0], [0], [1], [0, 0, 1, 1], [], []>} : vector<8x32xf32>, vector<32x128xf32>, vector<8x128xf32> -> vector<8x128xf32>
    %357 = arith.addf %355, %356 : vector<8x128xf32>
    %358 = arith.mulf %357, %8 : vector<8x128xf32>
    %359 = math.tanh %358 : vector<8x128xf32>
    %360 = vector.extract_strided_slice %359 {offsets = [0, 0], sizes = [8, 32], strides = [1, 1]} : vector<8x128xf32> to vector<8x32xf32>
    %cst_122 = arith.constant 5.000000e-01 : f32
    %361 = vector.broadcast %cst_122 : f32 to vector<8x32xf32>
    %362 = arith.mulf %361, %360 : vector<8x32xf32>
    %cst_123 = arith.constant 5.000000e-01 : f32
    %363 = vector.broadcast %cst_123 : f32 to vector<8x32xf32>
    %364 = arith.addf %362, %363 : vector<8x32xf32>
    %365 = vector.extract_strided_slice %359 {offsets = [0, 32], sizes = [8, 32], strides = [1, 1]} : vector<8x128xf32> to vector<8x32xf32>
    %cst_124 = arith.constant 5.000000e-01 : f32
    %366 = vector.broadcast %cst_124 : f32 to vector<8x32xf32>
    %367 = arith.mulf %366, %365 : vector<8x32xf32>
    %cst_125 = arith.constant 5.000000e-01 : f32
    %368 = vector.broadcast %cst_125 : f32 to vector<8x32xf32>
    %369 = arith.addf %367, %368 : vector<8x32xf32>
    %370 = vector.extract_strided_slice %359 {offsets = [0, 64], sizes = [8, 32], strides = [1, 1]} : vector<8x128xf32> to vector<8x32xf32>
    %371 = vector.extract_strided_slice %359 {offsets = [0, 96], sizes = [8, 32], strides = [1, 1]} : vector<8x128xf32> to vector<8x32xf32>
    %cst_126 = arith.constant 5.000000e-01 : f32
    %372 = vector.broadcast %cst_126 : f32 to vector<8x32xf32>
    %373 = arith.mulf %372, %371 : vector<8x32xf32>
    %cst_127 = arith.constant 5.000000e-01 : f32
    %374 = vector.broadcast %cst_127 : f32 to vector<8x32xf32>
    %375 = arith.addf %373, %374 : vector<8x32xf32>
    %376 = arith.mulf %369, %324 : vector<8x32xf32>
    %377 = arith.mulf %364, %370 : vector<8x32xf32>
    %378 = arith.addf %376, %377 : vector<8x32xf32>
    %379 = math.tanh %378 : vector<8x32xf32>
    %380 = arith.mulf %375, %379 : vector<8x32xf32>
    %cst_128 = arith.constant dense<0.000000e+00> : vector<8x128xf32>
    %381 = tpu.matmul %380, %14, %cst_128 {dimension_numbers = #tpu.dot_dimension_numbers<[1], [0], [0], [1], [0, 0, 1, 1], [], []>} : vector<8x32xf32>, vector<32x128xf32>, vector<8x128xf32> -> vector<8x128xf32>
    %cst_129 = arith.constant dense<0.000000e+00> : vector<8x128xf32>
    %382 = tpu.matmul %353, %12, %cst_129 {dimension_numbers = #tpu.dot_dimension_numbers<[1], [0], [0], [1], [0, 0, 1, 1], [], []>} : vector<8x32xf32>, vector<32x128xf32>, vector<8x128xf32> -> vector<8x128xf32>
    %383 = arith.addf %381, %382 : vector<8x128xf32>
    %384 = arith.addf %383, %18 : vector<8x128xf32>
    %385 = arith.mulf %384, %8 : vector<8x128xf32>
    %386 = math.tanh %385 : vector<8x128xf32>
    %387 = vector.extract_strided_slice %386 {offsets = [0, 0], sizes = [8, 32], strides = [1, 1]} : vector<8x128xf32> to vector<8x32xf32>
    %cst_130 = arith.constant 5.000000e-01 : f32
    %388 = vector.broadcast %cst_130 : f32 to vector<8x32xf32>
    %389 = arith.mulf %388, %387 : vector<8x32xf32>
    %cst_131 = arith.constant 5.000000e-01 : f32
    %390 = vector.broadcast %cst_131 : f32 to vector<8x32xf32>
    %391 = arith.addf %389, %390 : vector<8x32xf32>
    %392 = vector.extract_strided_slice %386 {offsets = [0, 32], sizes = [8, 32], strides = [1, 1]} : vector<8x128xf32> to vector<8x32xf32>
    %cst_132 = arith.constant 5.000000e-01 : f32
    %393 = vector.broadcast %cst_132 : f32 to vector<8x32xf32>
    %394 = arith.mulf %393, %392 : vector<8x32xf32>
    %cst_133 = arith.constant 5.000000e-01 : f32
    %395 = vector.broadcast %cst_133 : f32 to vector<8x32xf32>
    %396 = arith.addf %394, %395 : vector<8x32xf32>
    %397 = vector.extract_strided_slice %386 {offsets = [0, 64], sizes = [8, 32], strides = [1, 1]} : vector<8x128xf32> to vector<8x32xf32>
    %398 = vector.extract_strided_slice %386 {offsets = [0, 96], sizes = [8, 32], strides = [1, 1]} : vector<8x128xf32> to vector<8x32xf32>
    %cst_134 = arith.constant 5.000000e-01 : f32
    %399 = vector.broadcast %cst_134 : f32 to vector<8x32xf32>
    %400 = arith.mulf %399, %398 : vector<8x32xf32>
    %cst_135 = arith.constant 5.000000e-01 : f32
    %401 = vector.broadcast %cst_135 : f32 to vector<8x32xf32>
    %402 = arith.addf %400, %401 : vector<8x32xf32>
    %403 = arith.mulf %396, %351 : vector<8x32xf32>
    %404 = arith.mulf %391, %397 : vector<8x32xf32>
    %405 = arith.addf %403, %404 : vector<8x32xf32>
    %406 = math.tanh %405 : vector<8x32xf32>
    %407 = arith.mulf %402, %406 : vector<8x32xf32>
    %c48 = arith.constant 48 : index
    %c0_136 = arith.constant 0 : index
    %408 = vector.load %arg4[%c48, %c0_136] : memref<64x32xf32, #tpu.memory_space<vmem>>, vector<8x32xf32>
    tpu.vector_store %arg4[%c48, %c0_136], %407 {strides = array<i32>} : memref<64x32xf32, #tpu.memory_space<vmem>>, vector<8x32xf32>,
    %409 = vector.extract_strided_slice %26 {offsets = [56, 0], sizes = [8, 128], strides = [1, 1]} : vector<64x128xf32> to vector<8x128xf32>
    %cst_137 = arith.constant dense<0.000000e+00> : vector<8x128xf32>
    %410 = tpu.matmul %380, %10, %cst_137 {dimension_numbers = #tpu.dot_dimension_numbers<[1], [0], [0], [1], [0, 0, 1, 1], [], []>} : vector<8x32xf32>, vector<32x128xf32>, vector<8x128xf32> -> vector<8x128xf32>
    %411 = arith.addf %409, %410 : vector<8x128xf32>
    %412 = arith.mulf %411, %8 : vector<8x128xf32>
    %413 = math.tanh %412 : vector<8x128xf32>
    %414 = vector.extract_strided_slice %413 {offsets = [0, 0], sizes = [8, 32], strides = [1, 1]} : vector<8x128xf32> to vector<8x32xf32>
    %cst_138 = arith.constant 5.000000e-01 : f32
    %415 = vector.broadcast %cst_138 : f32 to vector<8x32xf32>
    %416 = arith.mulf %415, %414 : vector<8x32xf32>
    %cst_139 = arith.constant 5.000000e-01 : f32
    %417 = vector.broadcast %cst_139 : f32 to vector<8x32xf32>
    %418 = arith.addf %416, %417 : vector<8x32xf32>
    %419 = vector.extract_strided_slice %413 {offsets = [0, 32], sizes = [8, 32], strides = [1, 1]} : vector<8x128xf32> to vector<8x32xf32>
    %cst_140 = arith.constant 5.000000e-01 : f32
    %420 = vector.broadcast %cst_140 : f32 to vector<8x32xf32>
    %421 = arith.mulf %420, %419 : vector<8x32xf32>
    %cst_141 = arith.constant 5.000000e-01 : f32
    %422 = vector.broadcast %cst_141 : f32 to vector<8x32xf32>
    %423 = arith.addf %421, %422 : vector<8x32xf32>
    %424 = vector.extract_strided_slice %413 {offsets = [0, 64], sizes = [8, 32], strides = [1, 1]} : vector<8x128xf32> to vector<8x32xf32>
    %425 = vector.extract_strided_slice %413 {offsets = [0, 96], sizes = [8, 32], strides = [1, 1]} : vector<8x128xf32> to vector<8x32xf32>
    %cst_142 = arith.constant 5.000000e-01 : f32
    %426 = vector.broadcast %cst_142 : f32 to vector<8x32xf32>
    %427 = arith.mulf %426, %425 : vector<8x32xf32>
    %cst_143 = arith.constant 5.000000e-01 : f32
    %428 = vector.broadcast %cst_143 : f32 to vector<8x32xf32>
    %429 = arith.addf %427, %428 : vector<8x32xf32>
    %430 = arith.mulf %423, %378 : vector<8x32xf32>
    %431 = arith.mulf %418, %424 : vector<8x32xf32>
    %432 = arith.addf %430, %431 : vector<8x32xf32>
    %433 = math.tanh %432 : vector<8x32xf32>
    %434 = arith.mulf %429, %433 : vector<8x32xf32>
    %cst_144 = arith.constant dense<0.000000e+00> : vector<8x128xf32>
    %435 = tpu.matmul %434, %14, %cst_144 {dimension_numbers = #tpu.dot_dimension_numbers<[1], [0], [0], [1], [0, 0, 1, 1], [], []>} : vector<8x32xf32>, vector<32x128xf32>, vector<8x128xf32> -> vector<8x128xf32>
    %cst_145 = arith.constant dense<0.000000e+00> : vector<8x128xf32>
    %436 = tpu.matmul %407, %12, %cst_145 {dimension_numbers = #tpu.dot_dimension_numbers<[1], [0], [0], [1], [0, 0, 1, 1], [], []>} : vector<8x32xf32>, vector<32x128xf32>, vector<8x128xf32> -> vector<8x128xf32>
    %437 = arith.addf %435, %436 : vector<8x128xf32>
    %438 = arith.addf %437, %18 : vector<8x128xf32>
    %439 = arith.mulf %438, %8 : vector<8x128xf32>
    %440 = math.tanh %439 : vector<8x128xf32>
    %441 = vector.extract_strided_slice %440 {offsets = [0, 0], sizes = [8, 32], strides = [1, 1]} : vector<8x128xf32> to vector<8x32xf32>
    %cst_146 = arith.constant 5.000000e-01 : f32
    %442 = vector.broadcast %cst_146 : f32 to vector<8x32xf32>
    %443 = arith.mulf %442, %441 : vector<8x32xf32>
    %cst_147 = arith.constant 5.000000e-01 : f32
    %444 = vector.broadcast %cst_147 : f32 to vector<8x32xf32>
    %445 = arith.addf %443, %444 : vector<8x32xf32>
    %446 = vector.extract_strided_slice %440 {offsets = [0, 32], sizes = [8, 32], strides = [1, 1]} : vector<8x128xf32> to vector<8x32xf32>
    %cst_148 = arith.constant 5.000000e-01 : f32
    %447 = vector.broadcast %cst_148 : f32 to vector<8x32xf32>
    %448 = arith.mulf %447, %446 : vector<8x32xf32>
    %cst_149 = arith.constant 5.000000e-01 : f32
    %449 = vector.broadcast %cst_149 : f32 to vector<8x32xf32>
    %450 = arith.addf %448, %449 : vector<8x32xf32>
    %451 = vector.extract_strided_slice %440 {offsets = [0, 64], sizes = [8, 32], strides = [1, 1]} : vector<8x128xf32> to vector<8x32xf32>
    %452 = vector.extract_strided_slice %440 {offsets = [0, 96], sizes = [8, 32], strides = [1, 1]} : vector<8x128xf32> to vector<8x32xf32>
    %cst_150 = arith.constant 5.000000e-01 : f32
    %453 = vector.broadcast %cst_150 : f32 to vector<8x32xf32>
    %454 = arith.mulf %453, %452 : vector<8x32xf32>
    %cst_151 = arith.constant 5.000000e-01 : f32
    %455 = vector.broadcast %cst_151 : f32 to vector<8x32xf32>
    %456 = arith.addf %454, %455 : vector<8x32xf32>
    %457 = arith.mulf %450, %405 : vector<8x32xf32>
    %458 = arith.mulf %445, %451 : vector<8x32xf32>
    %459 = arith.addf %457, %458 : vector<8x32xf32>
    %460 = math.tanh %459 : vector<8x32xf32>
    %461 = arith.mulf %456, %460 : vector<8x32xf32>
    %c56 = arith.constant 56 : index
    %c0_152 = arith.constant 0 : index
    %462 = vector.load %arg4[%c56, %c0_152] : memref<64x32xf32, #tpu.memory_space<vmem>>, vector<8x32xf32>
    tpu.vector_store %arg4[%c56, %c0_152], %461 {strides = array<i32>} : memref<64x32xf32, #tpu.memory_space<vmem>>, vector<8x32xf32>,
    %c0_153 = arith.constant 0 : index
    %c0_154 = arith.constant 0 : index
    %c0_155 = arith.constant 0 : index
    %463 = vector.load %arg5[%c0_153, %c0_154, %c0_155] : memref<2x8x32xf32, #tpu.memory_space<vmem>>, vector<1x8x32xf32>
    %464 = vector.shape_cast %463 : vector<1x8x32xf32> to vector<8x32xf32>
    %465 = vector.shape_cast %434 : vector<8x32xf32> to vector<1x8x32xf32>
    tpu.vector_store %arg5[%c0_153, %c0_154, %c0_155], %465 {strides = array<i32>} : memref<2x8x32xf32, #tpu.memory_space<vmem>>, vector<1x8x32xf32>,
    %c0_156 = arith.constant 0 : index
    %c0_157 = arith.constant 0 : index
    %c0_158 = arith.constant 0 : index
    %466 = vector.load %arg6[%c0_156, %c0_157, %c0_158] : memref<2x8x32xf32, #tpu.memory_space<vmem>>, vector<1x8x32xf32>
    %467 = vector.shape_cast %466 : vector<1x8x32xf32> to vector<8x32xf32>
    %468 = vector.shape_cast %432 : vector<8x32xf32> to vector<1x8x32xf32>
    tpu.vector_store %arg6[%c0_156, %c0_157, %c0_158], %468 {strides = array<i32>} : memref<2x8x32xf32, #tpu.memory_space<vmem>>, vector<1x8x32xf32>,
    %c1_159 = arith.constant 1 : index
    %c0_160 = arith.constant 0 : index
    %c0_161 = arith.constant 0 : index
    %469 = vector.load %arg5[%c1_159, %c0_160, %c0_161] : memref<2x8x32xf32, #tpu.memory_space<vmem>>, vector<1x8x32xf32>
    %470 = vector.shape_cast %469 : vector<1x8x32xf32> to vector<8x32xf32>
    %471 = vector.shape_cast %461 : vector<8x32xf32> to vector<1x8x32xf32>
    tpu.vector_store %arg5[%c1_159, %c0_160, %c0_161], %471 {strides = array<i32>} : memref<2x8x32xf32, #tpu.memory_space<vmem>>, vector<1x8x32xf32>,
    %c1_162 = arith.constant 1 : index
    %c0_163 = arith.constant 0 : index
    %c0_164 = arith.constant 0 : index
    %472 = vector.load %arg6[%c1_162, %c0_163, %c0_164] : memref<2x8x32xf32, #tpu.memory_space<vmem>>, vector<1x8x32xf32>
    %473 = vector.shape_cast %472 : vector<1x8x32xf32> to vector<8x32xf32>
    %474 = vector.shape_cast %459 : vector<8x32xf32> to vector<1x8x32xf32>
    tpu.vector_store %arg6[%c1_162, %c0_163, %c0_164], %474 {strides = array<i32>} : memref<2x8x32xf32, #tpu.memory_space<vmem>>, vector<1x8x32xf32>,
    return
  }
}

</mosaic_0001>

<bundles_post_ra>
// kernel: _lstm_forward_packed.1
= control target key start
LH: loop header
LB: loop body
LE: loop exit
PB: predicated region body
PF: predicated region fallthrough
CT: control target
= control target key end

     0   :  { %12 = vsyncpa [#allocation3], 0  ;;  %s2932_s21 = smov [#allocation2]   ;;  %s3556_s0 = inlined_call_operand.vmem [shape: f32[64,32], index: 0, kind: input, shape index: {}]   ;;  %s3557_s1 = inlined_call_operand.vmem [shape: f32[2,32,128], index: 1, kind: input, shape index: {}]   ;;  %s3558_s2 = inlined_call_operand.hbm [shape: f32[2,32,128], index: 2, kind: input, shape index: {}]   ;;  %s3559_s3 = inlined_call_operand.vmem [shape: f32[2,1,128], index: 3, kind: input, shape index: {}]   ;;  %s3560_s4 = inlined_call_operand.vmem [shape: f32[64,32], index: 4, kind: output, shape index: {0}]   ;;  %s3561_s5 = inlined_call_operand.vmem [shape: f32[2,8,32], index: 5, kind: output, shape index: {1}]   ;;  %s3562_s6 = inlined_call_operand.vmem [shape: f32[2,8,32], index: 6, kind: output, shape index: {2}]  }
   0x1   :  { %s22_s22 = sshll.u32 %s2932_s21, 4  ;;  %s23_s22 = int_to_ptr.vmem [resolvable:$true] %s22_s22 }
   0x2   :  { %s2918_s23 = scalar_lea.vmem %s23_s22, 1024  ;;  %p2923_p1 = scmp.lt.s32.totalorder %s23_s22, %s23_s22 }
   0x3   :  { %p2919_p0 = scmp.ne.s32.totalorder %s23_s22, %s2918_s23  ;;  %p2924_p2 = scmp.lt.s32.totalorder %s2918_s23, %s2918_s23 }
   0x5   :  { %p2925_p3 = por %p2924_p2, %p2923_p1 }
   0x7   :  { %p2926_p4 = pnand %p2925_p3, %p2919_p0 }
   0x9   :  { %2929 = shalt.err (!%p2926_p4)
}
   0xa   :  { %s2933_s24 = smov 128   ;;  %s2934_s25 = smov 8  }
   0xb   :  { %28 = dma.hbm_to_vmem [thread:$0]  %s3558_s2, 1024, %s23_s22, [#allocation3], %s2933_s24, %s2933_s24, %s2934_s25  }
   0xc   :  { %2930 = dma.done.wait [#allocation3], 1024  }
   0xd   :  { %2931 = vsyncadd [#allocation3], 4294966272  ;;  %v2935_v0 = vmov 0.0   ;;  %vm2936_vm0 = vmmov 0   ;;  %v73_v1 = vld [vmem:[%s3557_s1 + $0x18] sm:$0xff]  ;;  %v72_v2 = vld [vmem:[%s3557_s1 + $0x10] sm:$0xff]  ;;  %v34_v11 = vlaneseq }
   0xe   :  { %2559 = vmatprep.subr.mxu1 %v2935_v0  ;;  %2567 = vmatprep.mubr.msk.f32.mxu1 %vm2936_vm0, %v2935_v0  ;;  %v2988_v3 = vld [vmem:[#allocation2 + $0x18] sm:$0xff]  ;;  %v2991_v4 = vld [vmem:[#allocation2 + $0x10] sm:$0xff]  ;;  %v71_v5 = vld [vmem:[%s3557_s1 + $0x8] sm:$0xff]  ;;  %vm81_vm1 = vcmask 261120   ;;  %v2937_v19 = vmov 0.5   ;;  %s2938_s17 = smov 64  }
   0xf   :  { %2539 = vmatprep.subr.mxu0 %v73_v1  ;;  %2560 = vmatpush3.msra.mxu1 %v2988_v3  ;;  %v62_v6 = vld [vmem:[%s3556_s0] sm:$0xff]  ;;  %v3001_v7 = vld [vmem:[#allocation2 + $0x8] sm:$0xff]  ;;  %v35_v12 = vand.u32 127, %v34_v11  ;;  %s2939_s18 = smov 32   ;;  %v3041_v31 = vld [vmem:[%s3557_s1 + $0x38] sm:$0xff] }
  0x10   :  { %2540 = vmatpush3.msra.mxu0 %v73_v1  ;;  %2561 = vmatprep.subr.mxu1 %v2935_v0  ;;  %v70_v8 = vld [vmem:[%s3557_s1] sm:$0xff]  ;;  %v63_v10 = vld [vmem:[%s3556_s0 + $0x8] sm:$0xff]  ;;  %v64_v32 = vld [vmem:[%s3556_s0 + $0x10] sm:$0xff] }
  0x11   :  { %2541 = vmatprep.subr.mxu0 %v72_v2  ;;  %2562 = vmatpush3.msra.mxu1 %v2991_v4  ;;  %v3008_v9 = vld [vmem:[#allocation2] sm:$0xff]  ;;  %vm36_vm2 = vcmp.ge.s32.totalorder %v35_v12, 64  ;;  %vm37_vm3 = vcmp.lt.s32.totalorder %v35_v12, 96  ;;  %v3046_v33 = vld [vmem:[#allocation2 + $0x38] sm:$0xff]  ;;  %v3053_v35 = vld [vmem:[#allocation2 + $0x30] sm:$0xff] }
  0x12   :  { %2542 = vmatpush3.msra.mxu0 %v72_v2  ;;  %2563 = vmatprep.subr.mxu1 %v2935_v0  ;;  %vm38_vm4 = vmand %vm36_vm2, %vm37_vm3  ;;  %v3027_v15 = vld [vmem:[%s3559_s3] ss:$0 sm:$0xff]  ;;  %v65_v34 = vld [vmem:[%s3556_s0 + $0x18] sm:$0xff] }
  0x13   :  { %2543 = vmatprep.subr.mxu0 %v71_v5  ;;  %2547 = vmatprep.mubr.msk.f32.mxu0 %vm81_vm1, %v62_v6  ;;  %v3030_v20 = vsel %vm38_vm4, 1.0, %v2937_v19  ;;  %v3058_v36 = vld [vmem:[%s3557_s1 + $0x30] sm:$0xff]  ;;  %v66_v37 = vld [vmem:[%s3556_s0 + $0x20] sm:$0xff]  ;;  %v3067_v38 = vld [vmem:[#allocation2 + $0x28] sm:$0xff] }
  0x14   :  { %2544 = vmatpush3.msra.mxu0 %v71_v5  ;;  %2564 = vmatpush3.msra.mxu1 %v3001_v7  ;;  %v67_v39 = vld [vmem:[%s3556_s0 + $0x28] sm:$0xff]  ;;  %v3076_v40 = vld [vmem:[#allocation2 + $0x20] sm:$0xff]  ;;  %v68_v42 = vld [vmem:[%s3556_s0 + $0x30] sm:$0xff] }
  0x15   :  { %2545 = vmatprep.subr.mxu0 %v70_v8  ;;  %2565 = vmatprep.subr.mxu1 %v2935_v0  ;;  %v3081_v41 = vld [vmem:[%s3557_s1 + $0x28] sm:$0xff]  ;;  %v69_v43 = vld [vmem:[%s3556_s0 + $0x38] sm:$0xff]  ;;  %v3102_v45 = vld [vmem:[%s3557_s1 + $0x20] sm:$0xff] }
  0x16   :  { %2546 = vmatpush3.msra.mxu0 %v70_v8  ;;  %2566 = vmatpush3.msra.mxu1 %v3008_v9  ;;  %v3160_v58 = vld [vmem:[%s3559_s3 + $0x1] ss:$0 sm:$0xff] }
  0x17   :  { %2548 = vmatmul.mubr.msk.f32.vlgmr.msra.gmra.mxu0 %vm81_vm1, %v63_v10  ;;  %2568 = vmatmul.mubr.f32.vlgmr.msra.gmra.mxu1 %v2935_v0 }
  0x18   :  { %2581 = vmatprep.subr.mxu0 %v2935_v0  ;;  %2570 = vmatprep.subr.mxu1 %v2935_v0 }
  0x19   :  { %2578 = vmatprep.mubr.msk.f32.mxu1 %vm2936_vm0, %v2935_v0  ;;  %2582 = vmatpush3.msra.mxu0 %v3041_v31 }
  0x1a   :  { %2550 = vmatprep.mubr.msk.f32.mxu0 %vm81_vm1, %v64_v32  ;;  %2571 = vmatpush3.msra.mxu1 %v3046_v33 }
  0x1b   :  { %2551 = vmatmul.mubr.msk.f32.gmra.mxu0 %vm81_vm1, %v65_v34  ;;  %2572 = vmatprep.subr.mxu1 %v2935_v0 }
  0x1c   :  { %2583 = vmatprep.subr.mxu0 %v2935_v0  ;;  %2573 = vmatpush3.msra.mxu1 %v3053_v35 }
  0x1d   :  { %2584 = vmatpush3.msra.mxu0 %v3058_v36  ;;  %2574 = vmatprep.subr.mxu1 %v2935_v0 }
  0x1e   :  { %2553 = vmatprep.mubr.msk.f32.mxu0 %vm81_vm1, %v66_v37  ;;  %2575 = vmatpush3.msra.mxu1 %v3067_v38 }
  0x1f   :  { %2554 = vmatmul.mubr.msk.f32.gmra.mxu0 %vm81_vm1, %v67_v39  ;;  %2576 = vmatprep.subr.mxu1 %v2935_v0 }
  0x20   :  { %2585 = vmatprep.subr.mxu0 %v2935_v0  ;;  %2577 = vmatpush3.msra.mxu1 %v3076_v40 }
  0x21   :  { %2586 = vmatpush3.msra.mxu0 %v3081_v41  ;;  %2592 = vmatprep.subr.mxu1 %v2935_v0 }
  0x22   :  { %2556 = vmatprep.mubr.msk.f32.mxu0 %vm81_vm1, %v68_v42  ;;  %2579 = vmatmul.mubr.f32.vlgmr.msra.gmra.mxu1 %v2935_v0 }
  0x23   :  { %2557 = vmatmul.mubr.msk.f32.gmra.mxu0 %vm81_vm1, %v69_v43  ;;  %2593 = vmatpush3.msra.mxu1 %v2988_v3 }
  0x24   :  { %2594 = vmatprep.subr.mxu1 %v2935_v0  ;;  %2587 = vmatprep.subr.mxu0 %v2935_v0 }
  0x25   :  { %2595 = vmatpush3.msra.mxu1 %v2991_v4  ;;  %2588 = vmatpush3.msra.mxu0 %v3102_v45 }
  0x26   :  { %2596 = vmatprep.subr.mxu1 %v2935_v0  ;;  %2589 = vmatprep.mubr.msk.f32.mxu0 %vm2936_vm0, %v2935_v0 }
  0x27   :  { %2597 = vmatpush3.msra.mxu1 %v3001_v7  ;;  %2600 = vmatprep.mubr.msk.f32.mxu1 %vm2936_vm0, %v2935_v0 }
  0x28   :  { %2598 = vmatprep.subr.mxu1 %v2935_v0  ;;  %2603 = vmatprep.subr.mxu0 %v2935_v0 }
  0x29   :  { %2599 = vmatpush3.msra.mxu1 %v3008_v9 }
  0x2a   :  { %2614 = vmatprep.subr.mxu1 %v2935_v0 }
  0xd7   :  { %v3022_v13 = vpop.f32.mrf.mxu0  ;;  %v280_v14 = vpop.f32.mrf.mxu1 }
  0xd8   :  { %v178_v57 = vadd.f32 %v3022_v13, %v3027_v15 }
  0xd9   :  { %v172_v16 = vpop.f32.mrf.mxu0  ;;  %v2569_v17 = vpop.f32.mrf.mxu1 }
  0xda   :  { %v173_v18 = vadd.f32 %v3027_v15, %v172_v16 }
  0xdb   :  { %v3143_v51 = vpop.f32.mrf.mxu0 }
  0xdc   :  { %v284_v21 = vadd.f32 %v280_v14, %v173_v18 }
  0xdd   :  { %v3145_v52 = vpop.f32.mrf.mxu0 }
  0xde   :  { %v285_v22 = vmul.f32 %v284_v21, %v3030_v20 }
  0xdf   :  { %v3147_v53 = vpop.f32.mrf.mxu0 }
  0xe0   :  { %2832 = vtanh.f32 %v285_v22 }
  0xe1   :  { %v3149_v54 = vpop.f32.mrf.mxu0 }
  0xe2   :  { %v372_v48 = vpop.f32.mrf.mxu1 }
  0xe3   :  { %v3151_v55 = vpop.f32.mrf.mxu0 }
  0xe4   :  { %v2580_v49 = vpop.f32.mrf.mxu1 }
  0xe5   :  { %v3153_v56 = vpop.f32.mrf.mxu0 }
  0xed   :  { %v2833_v23 = vpop.eup %2832 }
  0xee   :  { %291 = vrot.lane.b32.xlu0 %v2833_v23, %s2938_s17  ;;  %v287_v24 = vmul.f32 0.5, %v2833_v23 }
  0xf0   :  { %v288_v25 = vadd.f32 0.5, %v287_v24 }
  0xf2   :  { %v289_v28 = vmul.f32 0.0, %v288_v25 }
 0x160   :  { %v292_v26 = vpop.permute.xlu0 %291 }
 0x161   :  { %v294_v27 = vmul.f32 %v292_v26, %v288_v25 }
 0x163   :  { %296 = vrot.lane.b32.xlu0 %v294_v27, %s2939_s18 }
 0x1d5   :  { %v297_v29 = vpop.permute.xlu0 %296 }
 0x1d6   :  { %v3035_v30 = vadd.f32 %v297_v29, %v289_v28 }
 0x1d8   :  { %2834 = vtanh.f32 %v3035_v30 }
 0x1e5   :  { %v2835_v44 = vpop.eup %2834 }
 0x1e6   :  { %302 = vrot.lane.b32.xlu1 %v2835_v44, %s2938_s17 }
 0x258   :  { %v303_v46 = vpop.permute.xlu1 %302 }
 0x259   :  { %v305_v47 = vmul.f32 %v303_v46, %v288_v25 }
 0x25b   :  { %377 = vrot.lane.b32.xlu1 %v305_v47, %s2939_s18 }
 0x2cd   :  { %v378_v50 = vpop.permute.xlu1 %377 }
 0x2ce   :  { %2590 = vmatmul.mubr.msk.f32.vlgmr.msra.gmra.mxu0 %vm81_vm1, %v378_v50  ;;  %2601 = vmatmul.mubr.msk.f32.vlgmr.msra.gmra.mxu1 %vm81_vm1, %v378_v50  ;;  %v183_v50 = vadd.f32 %v3027_v15, %v3145_v52 }
 0x2cf   :  { %2615 = vmatpush3.msra.mxu1 %v3041_v31  ;;  %2604 = vmatpush3.msra.mxu0 %v3046_v33 }
 0x2d0   :  { %2616 = vmatprep.subr.mxu1 %v2935_v0  ;;  %2605 = vmatprep.subr.mxu0 %v2935_v0 }
 0x2d1   :  { %2617 = vmatpush3.msra.mxu1 %v3058_v36  ;;  %2606 = vmatpush3.msra.mxu0 %v3053_v35 }
 0x2d2   :  { %2618 = vmatprep.subr.mxu1 %v2935_v0  ;;  %2607 = vmatprep.subr.mxu0 %v2935_v0 }
 0x2d3   :  { %2619 = vmatpush3.msra.mxu1 %v3081_v41  ;;  %2608 = vmatpush3.msra.mxu0 %v3067_v38 }
 0x2d4   :  { %2620 = vmatprep.subr.mxu1 %v2935_v0  ;;  %2609 = vmatprep.subr.mxu0 %v2935_v0 }
 0x2d5   :  { %2621 = vmatpush3.msra.mxu1 %v3102_v45  ;;  %2622 = vmatprep.mubr.msk.f32.mxu1 %vm2936_vm0, %v2935_v0 }
 0x2d6   :  { %2610 = vmatpush3.msra.mxu0 %v3076_v40  ;;  %2611 = vmatprep.mubr.msk.f32.mxu0 %vm2936_vm0, %v2935_v0 }
 0x2d7   :  { %2625 = vmatprep.subr.mxu0 %v2935_v0  ;;  %2636 = vmatprep.subr.mxu1 %v2935_v0 }
 0x38e   :  { %v447_v59 = vpop.f32.mrf.mxu0  ;;  %v544_v60 = vpop.f32.mrf.mxu1 }
 0x38f   :  { %v448_v61 = vadd.f32 %v447_v59, %v372_v48  ;;  %v548_v62 = vadd.f32 %v544_v60, %v178_v57 }
 0x390   :  { %v2591_v63 = vpop.f32.mrf.mxu0  ;;  %v2602_v1 = vpop.f32.mrf.mxu1 }
 0x391   :  { %v451_v2 = vadd.f32 %v3160_v58, %v448_v61  ;;  %v549_v5 = vmul.f32 %v548_v62, %v3030_v20 }
 0x393   :  { %v452_v6 = vmul.f32 %v451_v2, %v3030_v20  ;;  %2836 = vtanh.f32 %v549_v5 }
 0x395   :  { %2838 = vtanh.f32 %v452_v6 }
 0x3a0   :  { %v2837_v8 = vpop.eup %2836 }
 0x3a1   :  { %555 = vrot.lane.b32.xlu1 %v2837_v8, %s2938_s17  ;;  %v551_v11 = vmul.f32 0.5, %v2837_v8 }
 0x3a2   :  { %v2839_v10 = vpop.eup %2838 }
 0x3a3   :  { %458 = vrot.lane.b32.xlu0 %v2839_v10, %s2938_s17  ;;  %v454_v12 = vmul.f32 0.5, %v2839_v10  ;;  %v552_v13 = vadd.f32 0.5, %v551_v11 }
 0x3a5   :  { %v455_v17 = vadd.f32 0.5, %v454_v12  ;;  %v553_v21 = vmul.f32 %v552_v13, %v3035_v30 }
 0x3a7   :  { %v456_v24 = vmul.f32 0.0, %v455_v17 }
 0x413   :  { %v556_v14 = vpop.permute.xlu1 %555 }
 0x414   :  { %v558_v16 = vmul.f32 %v556_v14, %v552_v13 }
 0x415   :  { %v459_v18 = vpop.permute.xlu0 %458 }
 0x416   :  { %v461_v19 = vmul.f32 %v459_v18, %v455_v17  ;;  %560 = vrot.lane.b32.xlu1 %v558_v16, %s2939_s18 }
 0x418   :  { %463 = vrot.lane.b32.xlu0 %v461_v19, %s2939_s18 }
 0x488   :  { %v561_v22 = vpop.permute.xlu1 %560 }
 0x489   :  { %v3170_v23 = vadd.f32 %v561_v22, %v553_v21 }
 0x48a   :  { %v464_v25 = vpop.permute.xlu0 %463 }
 0x48b   :  { %2840 = vtanh.f32 %v3170_v23  ;;  %v3173_v26 = vadd.f32 %v464_v25, %v456_v24 }
 0x48d   :  { %2842 = vtanh.f32 %v3173_v26 }
 0x498   :  { %v2841_v27 = vpop.eup %2840 }
 0x499   :  { %566 = vrot.lane.b32.xlu1 %v2841_v27, %s2938_s17 }
 0x49a   :  { %v2843_v28 = vpop.eup %2842 }
 0x49b   :  { %469 = vrot.lane.b32.xlu0 %v2843_v28, %s2938_s17 }
 0x50b   :  { %v567_v29 = vpop.permute.xlu1 %566 }
 0x50c   :  { %v569_v32 = vmul.f32 %v567_v29, %v552_v13 }
 0x50d   :  { %v470_v30 = vpop.permute.xlu0 %469 }
 0x50e   :  { %v472_v34 = vmul.f32 %v470_v30, %v455_v17  ;;  %643 = vrot.lane.b32.xlu1 %v569_v32, %s2939_s18  ;;  %v188_v30 = vadd.f32 %v3143_v51, %v3027_v15 }
 0x510   :  { %474 = vrot.lane.b32.xlu0 %v472_v34, %s2939_s18 }
 0x580   :  { %v644_v37 = vpop.permute.xlu1 %643 }
 0x581   :  { %2623 = vmatmul.mubr.msk.f32.vlgmr.msra.gmra.mxu1 %vm81_vm1, %v644_v37 }
 0x582   :  { %v475_v39 = vpop.permute.xlu0 %474  ;;  %2637 = vmatpush3.msra.mxu1 %v3046_v33  ;;  %2644 = vmatprep.mubr.msk.f32.mxu1 %vm2936_vm0, %v2935_v0 }
 0x583   :  { %477 = vst.msk [vmem:[%s3560_s4] sm:$0xff] %vm81_vm1, %v475_v39  ;;  %2612 = vmatmul.mubr.msk.f32.vlgmr.msra.gmra.mxu0 %vm81_vm1, %v475_v39  ;;  %2638 = vmatprep.subr.mxu1 %v2935_v0 }
 0x584   :  { %2626 = vmatpush3.msra.mxu0 %v2988_v3  ;;  %2633 = vmatprep.mubr.msk.f32.mxu0 %vm2936_vm0, %v2935_v0 }
 0x585   :  { %2627 = vmatprep.subr.mxu0 %v2935_v0  ;;  %2639 = vmatpush3.msra.mxu1 %v3053_v35 }
 0x586   :  { %2628 = vmatpush3.msra.mxu0 %v2991_v4  ;;  %2640 = vmatprep.subr.mxu1 %v2935_v0 }
 0x587   :  { %2629 = vmatprep.subr.mxu0 %v2935_v0  ;;  %2641 = vmatpush3.msra.mxu1 %v3067_v38 }
 0x588   :  { %2630 = vmatpush3.msra.mxu0 %v3001_v7  ;;  %2642 = vmatprep.subr.mxu1 %v2935_v0 }
 0x589   :  { %2631 = vmatprep.subr.mxu0 %v2935_v0  ;;  %2643 = vmatpush3.msra.mxu1 %v3076_v40 }
 0x58a   :  { %2632 = vmatpush3.msra.mxu0 %v3008_v9  ;;  %2658 = vmatprep.subr.mxu1 %v2935_v0 }
 0x58b   :  { %2634 = vmatmul.mubr.msk.f32.vlgmr.msra.gmra.mxu0 %vm81_vm1, %v644_v37  ;;  %2647 = vmatprep.subr.mxu0 %v2935_v0 }
 0x58c   :  { %2648 = vmatpush3.msra.mxu0 %v3041_v31  ;;  %2655 = vmatprep.mubr.msk.f32.mxu0 %vm2936_vm0, %v2935_v0 }
 0x58d   :  { %2649 = vmatprep.subr.mxu0 %v2935_v0 }
 0x58e   :  { %2650 = vmatpush3.msra.mxu0 %v3058_v36 }
 0x58f   :  { %2651 = vmatprep.subr.mxu0 %v2935_v0 }
 0x590   :  { %2652 = vmatpush3.msra.mxu0 %v3081_v41 }
 0x591   :  { %2653 = vmatprep.subr.mxu0 %v2935_v0 }
 0x592   :  { %2654 = vmatpush3.msra.mxu0 %v3102_v45 }
 0x593   :  { %2669 = vmatprep.subr.mxu0 %v2935_v0 }
 0x641   :  { %v713_v42 = vpop.f32.mrf.mxu1 }
 0x643   :  { %v638_v43 = vpop.f32.mrf.mxu0  ;;  %v2624_v44 = vpop.f32.mrf.mxu1 }
 0x644   :  { %v714_v46 = vadd.f32 %v713_v42, %v638_v43 }
 0x645   :  { %v2613_v47 = vpop.f32.mrf.mxu0 }
 0x646   :  { %v717_v48 = vadd.f32 %v3160_v58, %v714_v46 }
 0x648   :  { %v718_v49 = vmul.f32 %v717_v48, %v3030_v20 }
 0x64a   :  { %2844 = vtanh.f32 %v718_v49 }
 0x64b   :  { %v810_v57 = vpop.f32.mrf.mxu0 }
 0x64c   :  { %v814_v59 = vadd.f32 %v810_v57, %v183_v50 }
 0x64d   :  { %v2635_v60 = vpop.f32.mrf.mxu0 }
 0x64e   :  { %v815_v61 = vmul.f32 %v814_v59, %v3030_v20 }
 0x650   :  { %2846 = vtanh.f32 %v815_v61 }
 0x657   :  { %v2845_v62 = vpop.eup %2844 }
 0x658   :  { %724 = vrot.lane.b32.xlu0 %v2845_v62, %s2938_s17  ;;  %v720_v1 = vmul.f32 0.5, %v2845_v62 }
 0x65a   :  { %v721_v2 = vadd.f32 0.5, %v720_v1 }
 0x65c   :  { %v722_v12 = vmul.f32 %v721_v2, %v3173_v26 }
 0x65d   :  { %v2847_v63 = vpop.eup %2846 }
 0x65e   :  { %821 = vrot.lane.b32.xlu1 %v2847_v63, %s2938_s17  ;;  %v817_v8 = vmul.f32 0.5, %v2847_v63 }
 0x660   :  { %v818_v52 = vadd.f32 0.5, %v817_v8 }
 0x662   :  { %v819_v16 = vmul.f32 %v818_v52, %v3170_v23 }
 0x6ca   :  { %v725_v5 = vpop.permute.xlu0 %724 }
 0x6cb   :  { %v727_v6 = vmul.f32 %v725_v5, %v721_v2 }
 0x6cd   :  { %729 = vrot.lane.b32.xlu0 %v727_v6, %s2939_s18 }
 0x6d0   :  { %v822_v10 = vpop.permute.xlu1 %821 }
 0x6d1   :  { %v824_v11 = vmul.f32 %v822_v10, %v818_v52 }
 0x6d3   :  { %826 = vrot.lane.b32.xlu1 %v824_v11, %s2939_s18 }
 0x73f   :  { %v730_v13 = vpop.permute.xlu0 %729 }
 0x740   :  { %v3227_v14 = vadd.f32 %v730_v13, %v722_v12 }
 0x742   :  { %2848 = vtanh.f32 %v3227_v14 }
 0x745   :  { %v827_v17 = vpop.permute.xlu1 %826 }
 0x746   :  { %v3231_v18 = vadd.f32 %v827_v17, %v819_v16 }
 0x748   :  { %2850 = vtanh.f32 %v3231_v18 }
 0x74f   :  { %v2849_v19 = vpop.eup %2848 }
 0x750   :  { %735 = vrot.lane.b32.xlu0 %v2849_v19, %s2938_s17 }
 0x755   :  { %v2851_v21 = vpop.eup %2850 }
 0x756   :  { %832 = vrot.lane.b32.xlu1 %v2851_v21, %s2938_s17 }
 0x7c2   :  { %v736_v22 = vpop.permute.xlu0 %735 }
 0x7c3   :  { %v738_v24 = vmul.f32 %v736_v22, %v721_v2 }
 0x7c5   :  { %740 = vrot.lane.b32.xlu0 %v738_v24, %s2939_s18 }
 0x7c8   :  { %v833_v25 = vpop.permute.xlu1 %832 }
 0x7c9   :  { %v835_v26 = vmul.f32 %v833_v25, %v818_v52 }
 0x7cb   :  { %909 = vrot.lane.b32.xlu1 %v835_v26, %s2939_s18 }
 0x837   :  { %v741_v23 = vpop.permute.xlu0 %740 }
 0x838   :  { %743 = vst.msk [vmem:[%s3560_s4 + $0x8] sm:$0xff] %vm81_vm1, %v741_v23  ;;  %2645 = vmatmul.mubr.msk.f32.vlgmr.msra.gmra.mxu1 %vm81_vm1, %v741_v23 }
 0x839   :  { %2659 = vmatpush3.msra.mxu1 %v2988_v3  ;;  %2666 = vmatprep.mubr.msk.f32.mxu1 %vm2936_vm0, %v2935_v0 }
 0x83a   :  { %2660 = vmatprep.subr.mxu1 %v2935_v0 }
 0x83b   :  { %2661 = vmatpush3.msra.mxu1 %v2991_v4 }
 0x83c   :  { %2662 = vmatprep.subr.mxu1 %v2935_v0 }
 0x83d   :  { %v910_v27 = vpop.permute.xlu1 %909  ;;  %2663 = vmatpush3.msra.mxu1 %v3001_v7 }
 0x83e   :  { %2656 = vmatmul.mubr.msk.f32.vlgmr.msra.gmra.mxu0 %vm81_vm1, %v910_v27  ;;  %2664 = vmatprep.subr.mxu1 %v2935_v0 }
 0x83f   :  { %2665 = vmatpush3.msra.mxu1 %v3008_v9  ;;  %2670 = vmatpush3.msra.mxu0 %v3046_v33 }
 0x840   :  { %2667 = vmatmul.mubr.msk.f32.vlgmr.msra.gmra.mxu1 %vm81_vm1, %v910_v27  ;;  %2680 = vmatprep.subr.mxu1 %v2935_v0  ;;  %v193_v27 = vadd.f32 %v3027_v15, %v3149_v54 }
 0x841   :  { %2671 = vmatprep.subr.mxu0 %v2935_v0  ;;  %2681 = vmatpush3.msra.mxu1 %v3041_v31 }
 0x842   :  { %2672 = vmatpush3.msra.mxu0 %v3053_v35  ;;  %2682 = vmatprep.subr.mxu1 %v2935_v0 }
 0x843   :  { %2673 = vmatprep.subr.mxu0 %v2935_v0  ;;  %2683 = vmatpush3.msra.mxu1 %v3058_v36 }
 0x844   :  { %2674 = vmatpush3.msra.mxu0 %v3067_v38  ;;  %2684 = vmatprep.subr.mxu1 %v2935_v0 }
 0x845   :  { %2675 = vmatprep.subr.mxu0 %v2935_v0  ;;  %2685 = vmatpush3.msra.mxu1 %v3081_v41 }
 0x846   :  { %2676 = vmatpush3.msra.mxu0 %v3076_v40  ;;  %2686 = vmatprep.subr.mxu1 %v2935_v0 }
 0x847   :  { %2677 = vmatprep.mubr.msk.f32.mxu0 %vm2936_vm0, %v2935_v0  ;;  %2687 = vmatpush3.msra.mxu1 %v3102_v45 }
 0x848   :  { %2688 = vmatprep.mubr.msk.f32.mxu1 %vm2936_vm0, %v2935_v0  ;;  %2691 = vmatprep.subr.mxu0 %v2935_v0 }
 0x849   :  { %2702 = vmatprep.subr.mxu1 %v2935_v0 }
 0x8f8   :  { %v904_v28 = vpop.f32.mrf.mxu1 }
 0x8fa   :  { %v2646_v29 = vpop.f32.mrf.mxu1 }
 0x8fe   :  { %v979_v32 = vpop.f32.mrf.mxu0 }
 0x8ff   :  { %v980_v34 = vadd.f32 %v979_v32, %v904_v28 }
 0x900   :  { %v2657_v37 = vpop.f32.mrf.mxu0  ;;  %v1076_v39 = vpop.f32.mrf.mxu1 }
 0x901   :  { %v983_v42 = vadd.f32 %v3160_v58, %v980_v34  ;;  %v1080_v43 = vadd.f32 %v1076_v39, %v188_v30 }
 0x902   :  { %v2668_v44 = vpop.f32.mrf.mxu1 }
 0x903   :  { %v984_v46 = vmul.f32 %v983_v42, %v3030_v20  ;;  %v1081_v47 = vmul.f32 %v1080_v43, %v3030_v20 }
 0x905   :  { %2852 = vtanh.f32 %v984_v46 }
 0x906   :  { %2854 = vtanh.f32 %v1081_v47 }
 0x912   :  { %v2853_v48 = vpop.eup %2852 }
 0x913   :  { %v2855_v49 = vpop.eup %2854  ;;  %990 = vrot.lane.b32.xlu0 %v2853_v48, %s2938_s17  ;;  %v986_v51 = vmul.f32 0.5, %v2853_v48 }
 0x914   :  { %1087 = vrot.lane.b32.xlu1 %v2855_v49, %s2938_s17  ;;  %v1083_v50 = vmul.f32 0.5, %v2855_v49 }
 0x915   :  { %v987_v57 = vadd.f32 0.5, %v986_v51 }
 0x916   :  { %v1084_v60 = vadd.f32 0.5, %v1083_v50 }
 0x917   :  { %v988_v1 = vmul.f32 %v987_v57, %v3227_v14 }
 0x918   :  { %v1085_v5 = vmul.f32 %v1084_v60, %v3231_v18 }
 0x985   :  { %v991_v59 = vpop.permute.xlu0 %990 }
 0x986   :  { %v993_v61 = vmul.f32 %v991_v59, %v987_v57  ;;  %v1088_v62 = vpop.permute.xlu1 %1087 }
 0x987   :  { %v1090_v63 = vmul.f32 %v1088_v62, %v1084_v60 }
 0x988   :  { %995 = vrot.lane.b32.xlu0 %v993_v61, %s2939_s18 }
 0x989   :  { %1092 = vrot.lane.b32.xlu1 %v1090_v63, %s2939_s18 }
 0x9fa   :  { %v996_v2 = vpop.permute.xlu0 %995 }
 0x9fb   :  { %v3286_v6 = vadd.f32 %v996_v2, %v988_v1  ;;  %v1093_v8 = vpop.permute.xlu1 %1092 }
 0x9fc   :  { %v3288_v52 = vadd.f32 %v1093_v8, %v1085_v5 }
 0x9fd   :  { %2856 = vtanh.f32 %v3286_v6 }
 0x9fe   :  { %2858 = vtanh.f32 %v3288_v52 }
 0xa0a   :  { %v2857_v10 = vpop.eup %2856 }
 0xa0b   :  { %v2859_v11 = vpop.eup %2858  ;;  %1001 = vrot.lane.b32.xlu0 %v2857_v10, %s2938_s17 }
 0xa0c   :  { %1098 = vrot.lane.b32.xlu1 %v2859_v11, %s2938_s17 }
 0xa7d   :  { %v1002_v12 = vpop.permute.xlu0 %1001 }
 0xa7e   :  { %v1004_v13 = vmul.f32 %v1002_v12, %v987_v57  ;;  %v1099_v14 = vpop.permute.xlu1 %1098 }
 0xa7f   :  { %v1101_v16 = vmul.f32 %v1099_v14, %v1084_v60 }
 0xa80   :  { %1006 = vrot.lane.b32.xlu0 %v1004_v13, %s2939_s18  ;;  %v198_v13 = vadd.f32 %v3147_v53, %v3027_v15 }
 0xa81   :  { %1175 = vrot.lane.b32.xlu1 %v1101_v16, %s2939_s18 }
 0xaf2   :  { %v1007_v17 = vpop.permute.xlu0 %1006 }
 0xaf3   :  { %1009 = vst.msk [vmem:[%s3560_s4 + $0x10] sm:$0xff] %vm81_vm1, %v1007_v17  ;;  %v1176_v18 = vpop.permute.xlu1 %1175  ;;  %2678 = vmatmul.mubr.msk.f32.vlgmr.msra.gmra.mxu0 %vm81_vm1, %v1007_v17 }
 0xaf4   :  { %2689 = vmatmul.mubr.msk.f32.vlgmr.msra.gmra.mxu1 %vm81_vm1, %v1176_v18  ;;  %2692 = vmatpush3.msra.mxu0 %v2988_v3 }
 0xaf5   :  { %2693 = vmatprep.subr.mxu0 %v2935_v0  ;;  %2699 = vmatprep.mubr.msk.f32.mxu0 %vm2936_vm0, %v2935_v0 }
 0xaf6   :  { %2694 = vmatpush3.msra.mxu0 %v2991_v4  ;;  %2703 = vmatpush3.msra.mxu1 %v3046_v33 }
 0xaf7   :  { %2695 = vmatprep.subr.mxu0 %v2935_v0  ;;  %2704 = vmatprep.subr.mxu1 %v2935_v0 }
 0xaf8   :  { %2696 = vmatpush3.msra.mxu0 %v3001_v7  ;;  %2705 = vmatpush3.msra.mxu1 %v3053_v35 }
 0xaf9   :  { %2697 = vmatprep.subr.mxu0 %v2935_v0  ;;  %2706 = vmatprep.subr.mxu1 %v2935_v0 }
 0xafa   :  { %2698 = vmatpush3.msra.mxu0 %v3008_v9  ;;  %2707 = vmatpush3.msra.mxu1 %v3067_v38 }
 0xafb   :  { %2700 = vmatmul.mubr.msk.f32.vlgmr.msra.gmra.mxu0 %vm81_vm1, %v1176_v18  ;;  %2708 = vmatprep.subr.mxu1 %v2935_v0 }
 0xafc   :  { %2713 = vmatprep.subr.mxu0 %v2935_v0  ;;  %2709 = vmatpush3.msra.mxu1 %v3076_v40 }
 0xafd   :  { %2714 = vmatpush3.msra.mxu0 %v3041_v31  ;;  %2710 = vmatprep.mubr.msk.f32.mxu1 %vm2936_vm0, %v2935_v0 }
 0xafe   :  { %2715 = vmatprep.subr.mxu0 %v2935_v0  ;;  %2724 = vmatprep.subr.mxu1 %v2935_v0 }
 0xaff   :  { %2716 = vmatpush3.msra.mxu0 %v3058_v36  ;;  %2721 = vmatprep.mubr.msk.f32.mxu0 %vm2936_vm0, %v2935_v0 }
 0xb00   :  { %2717 = vmatprep.subr.mxu0 %v2935_v0 }
 0xb01   :  { %2718 = vmatpush3.msra.mxu0 %v3081_v41 }
 0xb02   :  { %2719 = vmatprep.subr.mxu0 %v2935_v0 }
 0xb03   :  { %2720 = vmatpush3.msra.mxu0 %v3102_v45 }
 0xb04   :  { %2735 = vmatprep.subr.mxu0 %v2935_v0 }
 0xbb3   :  { %v1170_v19 = vpop.f32.mrf.mxu0 }
 0xbb4   :  { %v1245_v21 = vpop.f32.mrf.mxu1 }
 0xbb5   :  { %v1246_v22 = vadd.f32 %v1245_v21, %v1170_v19  ;;  %v2679_v24 = vpop.f32.mrf.mxu0 }
 0xbb6   :  { %v2690_v25 = vpop.f32.mrf.mxu1 }
 0xbb7   :  { %v1249_v26 = vadd.f32 %v3160_v58, %v1246_v22 }
 0xbb9   :  { %v1250_v23 = vmul.f32 %v1249_v26, %v3030_v20 }
 0xbbb   :  { %2860 = vtanh.f32 %v1250_v23  ;;  %v1342_v28 = vpop.f32.mrf.mxu0 }
 0xbbc   :  { %v1346_v29 = vadd.f32 %v1342_v28, %v193_v27 }
 0xbbd   :  { %v2701_v32 = vpop.f32.mrf.mxu0 }
 0xbbe   :  { %v1347_v30 = vmul.f32 %v1346_v29, %v3030_v20 }
 0xbc0   :  { %2862 = vtanh.f32 %v1347_v30 }
 0xbc8   :  { %v2861_v34 = vpop.eup %2860 }
 0xbc9   :  { %1256 = vrot.lane.b32.xlu0 %v2861_v34, %s2938_s17  ;;  %v1252_v39 = vmul.f32 0.5, %v2861_v34 }
 0xbcb   :  { %v1253_v42 = vadd.f32 0.5, %v1252_v39 }
 0xbcd   :  { %v2863_v37 = vpop.eup %2862  ;;  %v1254_v49 = vmul.f32 %v1253_v42, %v3286_v6 }
 0xbce   :  { %1353 = vrot.lane.b32.xlu1 %v2863_v37, %s2938_s17  ;;  %v1349_v44 = vmul.f32 0.5, %v2863_v37 }
 0xbd0   :  { %v1350_v54 = vadd.f32 0.5, %v1349_v44 }
 0xbd2   :  { %v1351_v57 = vmul.f32 %v1350_v54, %v3288_v52 }
 0xc3b   :  { %v1257_v43 = vpop.permute.xlu0 %1256 }
 0xc3c   :  { %v1259_v46 = vmul.f32 %v1257_v43, %v1253_v42 }
 0xc3e   :  { %1261 = vrot.lane.b32.xlu0 %v1259_v46, %s2939_s18 }
 0xc40   :  { %v1354_v47 = vpop.permute.xlu1 %1353 }
 0xc41   :  { %v1356_v48 = vmul.f32 %v1354_v47, %v1350_v54 }
 0xc43   :  { %1358 = vrot.lane.b32.xlu1 %v1356_v48, %s2939_s18 }
 0xcb0   :  { %v1262_v51 = vpop.permute.xlu0 %1261 }
 0xcb1   :  { %v3343_v50 = vadd.f32 %v1262_v51, %v1254_v49 }
 0xcb3   :  { %2864 = vtanh.f32 %v3343_v50 }
 0xcb5   :  { %v1359_v59 = vpop.permute.xlu1 %1358 }
 0xcb6   :  { %v3347_v60 = vadd.f32 %v1359_v59, %v1351_v57 }
 0xcb8   :  { %2866 = vtanh.f32 %v3347_v60 }
 0xcc0   :  { %v2865_v61 = vpop.eup %2864 }
 0xcc1   :  { %1267 = vrot.lane.b32.xlu0 %v2865_v61, %s2938_s17 }
 0xcc5   :  { %v2867_v62 = vpop.eup %2866 }
 0xcc6   :  { %1364 = vrot.lane.b32.xlu1 %v2867_v62, %s2938_s17 }
 0xd33   :  { %v1268_v63 = vpop.permute.xlu0 %1267 }
 0xd34   :  { %v1270_v1 = vmul.f32 %v1268_v63, %v1253_v42 }
 0xd36   :  { %1272 = vrot.lane.b32.xlu0 %v1270_v1, %s2939_s18 }
 0xd38   :  { %v1365_v2 = vpop.permute.xlu1 %1364 }
 0xd39   :  { %v1367_v5 = vmul.f32 %v1365_v2, %v1350_v54 }
 0xd3b   :  { %1441 = vrot.lane.b32.xlu1 %v1367_v5, %s2939_s18 }
 0xda8   :  { %v1273_v6 = vpop.permute.xlu0 %1272 }
 0xda9   :  { %1275 = vst.msk [vmem:[%s3560_s4 + $0x18] sm:$0xff] %vm81_vm1, %v1273_v6  ;;  %2711 = vmatmul.mubr.msk.f32.vlgmr.msra.gmra.mxu1 %vm81_vm1, %v1273_v6 }
 0xdaa   :  { %2725 = vmatpush3.msra.mxu1 %v2988_v3  ;;  %2732 = vmatprep.mubr.msk.f32.mxu1 %vm2936_vm0, %v2935_v0 }
 0xdab   :  { %2726 = vmatprep.subr.mxu1 %v2935_v0 }
 0xdac   :  { %2727 = vmatpush3.msra.mxu1 %v2991_v4 }
 0xdad   :  { %2728 = vmatprep.subr.mxu1 %v2935_v0  ;;  %v1442_v8 = vpop.permute.xlu1 %1441 }
 0xdae   :  { %2729 = vmatpush3.msra.mxu1 %v3001_v7  ;;  %2722 = vmatmul.mubr.msk.f32.vlgmr.msra.gmra.mxu0 %vm81_vm1, %v1442_v8 }
 0xdaf   :  { %2730 = vmatprep.subr.mxu1 %v2935_v0  ;;  %2736 = vmatpush3.msra.mxu0 %v3046_v33 }
 0xdb0   :  { %2731 = vmatpush3.msra.mxu1 %v3008_v9  ;;  %2737 = vmatprep.subr.mxu0 %v2935_v0 }
 0xdb1   :  { %2733 = vmatmul.mubr.msk.f32.vlgmr.msra.gmra.mxu1 %vm81_vm1, %v1442_v8  ;;  %2746 = vmatprep.subr.mxu1 %v2935_v0 }
 0xdb2   :  { %2747 = vmatpush3.msra.mxu1 %v3041_v31  ;;  %2738 = vmatpush3.msra.mxu0 %v3053_v35 }
 0xdb3   :  { %2748 = vmatprep.subr.mxu1 %v2935_v0  ;;  %2739 = vmatprep.subr.mxu0 %v2935_v0 }
 0xdb4   :  { %2749 = vmatpush3.msra.mxu1 %v3058_v36  ;;  %2740 = vmatpush3.msra.mxu0 %v3067_v38 }
 0xdb5   :  { %2750 = vmatprep.subr.mxu1 %v2935_v0  ;;  %2741 = vmatprep.subr.mxu0 %v2935_v0 }
 0xdb6   :  { %2751 = vmatpush3.msra.mxu1 %v3081_v41  ;;  %2742 = vmatpush3.msra.mxu0 %v3076_v40 }
 0xdb7   :  { %2752 = vmatprep.subr.mxu1 %v2935_v0  ;;  %2743 = vmatprep.mubr.msk.f32.mxu0 %vm2936_vm0, %v2935_v0 }
 0xdb8   :  { %2753 = vmatpush3.msra.mxu1 %v3102_v45  ;;  %2754 = vmatprep.mubr.msk.f32.mxu1 %vm2936_vm0, %v2935_v0 }
 0xdb9   :  { %2757 = vmatprep.subr.mxu0 %v2935_v0  ;;  %2768 = vmatprep.subr.mxu1 %v2935_v0 }
 0xe69   :  { %v1436_v52 = vpop.f32.mrf.mxu1 }
 0xe6b   :  { %v2712_v10 = vpop.f32.mrf.mxu1 }
 0xe6e   :  { %v1511_v11 = vpop.f32.mrf.mxu0 }
 0xe6f   :  { %v1512_v12 = vadd.f32 %v1511_v11, %v1436_v52 }
 0xe70   :  { %v2723_v14 = vpop.f32.mrf.mxu0 }
 0xe71   :  { %v1515_v16 = vadd.f32 %v3160_v58, %v1512_v12  ;;  %v1608_v17 = vpop.f32.mrf.mxu1 }
 0xe72   :  { %v1612_v18 = vadd.f32 %v1608_v17, %v198_v13 }
 0xe73   :  { %v1516_v19 = vmul.f32 %v1515_v16, %v3030_v20  ;;  %v2734_v21 = vpop.f32.mrf.mxu1 }
 0xe74   :  { %v1613_v22 = vmul.f32 %v1612_v18, %v3030_v20 }
 0xe75   :  { %2868 = vtanh.f32 %v1516_v19 }
 0xe76   :  { %2870 = vtanh.f32 %v1613_v22  ;;  %v2896_v22 = vld [vmem:[#allocation2 + $0x18] sm:$0xff] }
 0xe82   :  { %v2869_v24 = vpop.eup %2868 }
 0xe83   :  { %v2871_v25 = vpop.eup %2870  ;;  %1522 = vrot.lane.b32.xlu0 %v2869_v24, %s2938_s17  ;;  %v1518_v26 = vmul.f32 0.5, %v2869_v24  ;;  %v2897_v24 = vld [vmem:[#allocation2 + $0x10] sm:$0xff] }
 0xe84   :  { %1619 = vrot.lane.b32.xlu1 %v2871_v25, %s2938_s17  ;;  %v1615_v53 = vmul.f32 0.5, %v2871_v25 }
 0xe85   :  { %v1519_v23 = vadd.f32 0.5, %v1518_v26  ;;  %v2898_v26 = vld [vmem:[#allocation2 + $0x8] sm:$0xff] }
 0xe86   :  { %v1616_v28 = vadd.f32 0.5, %v1615_v53  ;;  %v2899_v53 = vld [vmem:[#allocation2 + $0x38] sm:$0xff] }
 0xe87   :  { %v1520_v34 = vmul.f32 %v1519_v23, %v3343_v50 }
 0xe88   :  { %v1617_v39 = vmul.f32 %v1616_v28, %v3347_v60 }
 0xef5   :  { %v1523_v27 = vpop.permute.xlu0 %1522 }
 0xef6   :  { %v1525_v29 = vmul.f32 %v1523_v27, %v1519_v23  ;;  %v1620_v32 = vpop.permute.xlu1 %1619  ;;  %v2901_v27 = vld [vmem:[%s3557_s1 + $0x38] sm:$0xff] }
 0xef7   :  { %v1622_v30 = vmul.f32 %v1620_v32, %v1616_v28  ;;  %v2904_v32 = vld [vmem:[#allocation2 + $0x28] sm:$0xff] }
 0xef8   :  { %1527 = vrot.lane.b32.xlu0 %v1525_v29, %s2939_s18  ;;  %v2903_v29 = vld [vmem:[%s3557_s1 + $0x30] sm:$0xff] }
 0xef9   :  { %1624 = vrot.lane.b32.xlu1 %v1622_v30, %s2939_s18  ;;  %v2905_v30 = vld [vmem:[%s3557_s1 + $0x28] sm:$0xff] }
 0xf6a   :  { %v1528_v37 = vpop.permute.xlu0 %1527 }
 0xf6b   :  { %v3402_v42 = vadd.f32 %v1528_v37, %v1520_v34  ;;  %v1625_v43 = vpop.permute.xlu1 %1624  ;;  %v2906_v34 = vld [vmem:[#allocation2 + $0x20] sm:$0xff] }
 0xf6c   :  { %v3404_v44 = vadd.f32 %v1625_v43, %v1617_v39  ;;  %v2907_v37 = vld [vmem:[%s3557_s1 + $0x20] sm:$0xff] }
 0xf6d   :  { %2872 = vtanh.f32 %v3402_v42 }
 0xf6e   :  { %2874 = vtanh.f32 %v3404_v44 }
 0xf7a   :  { %v2873_v46 = vpop.eup %2872 }
 0xf7b   :  { %v2875_v54 = vpop.eup %2874  ;;  %1533 = vrot.lane.b32.xlu0 %v2873_v46, %s2938_s17  ;;  %v2908_v46 = vld [vmem:[%s3559_s3] ss:$0 sm:$0xff] }
 0xf7c   :  { %1630 = vrot.lane.b32.xlu1 %v2875_v54, %s2938_s17  ;;  %v208_v54 = vadd.f32 %v2908_v46, %v3151_v55 }
 0xfed   :  { %v1534_v47 = vpop.permute.xlu0 %1533 }
 0xfee   :  { %v1536_v48 = vmul.f32 %v1534_v47, %v1519_v23  ;;  %v1631_v49 = vpop.permute.xlu1 %1630  ;;  %v2900_v23 = vld [vmem:[#allocation2] sm:$0xff] }
 0xfef   :  { %v1633_v51 = vmul.f32 %v1631_v49, %v1616_v28  ;;  %v2902_v28 = vld [vmem:[#allocation2 + $0x30] sm:$0xff] }
 0xff0   :  { %1538 = vrot.lane.b32.xlu0 %v1536_v48, %s2939_s18 }
 0xff1   :  { %1707 = vrot.lane.b32.xlu1 %v1633_v51, %s2939_s18 }
0x1062   :  { %v1539_v50 = vpop.permute.xlu0 %1538 }
0x1063   :  { %1541 = vst.msk [vmem:[%s3560_s4 + $0x20] sm:$0xff] %vm81_vm1, %v1539_v50  ;;  %v1708_v57 = vpop.permute.xlu1 %1707  ;;  %2744 = vmatmul.mubr.msk.f32.vlgmr.msra.gmra.mxu0 %vm81_vm1, %v1539_v50 }
0x1064   :  { %2755 = vmatmul.mubr.msk.f32.vlgmr.msra.gmra.mxu1 %vm81_vm1, %v1708_v57  ;;  %2758 = vmatpush3.msra.mxu0 %v2988_v3 }
0x1065   :  { %2759 = vmatprep.subr.mxu0 %v2935_v0  ;;  %2765 = vmatprep.mubr.msk.f32.mxu0 %vm2936_vm0, %v2935_v0 }
0x1066   :  { %2760 = vmatpush3.msra.mxu0 %v2991_v4  ;;  %2769 = vmatpush3.msra.mxu1 %v3046_v33 }
0x1067   :  { %2761 = vmatprep.subr.mxu0 %v2935_v0  ;;  %2770 = vmatprep.subr.mxu1 %v2935_v0 }
0x1068   :  { %2762 = vmatpush3.msra.mxu0 %v3001_v7  ;;  %2771 = vmatpush3.msra.mxu1 %v3053_v35 }
0x1069   :  { %2763 = vmatprep.subr.mxu0 %v2935_v0  ;;  %2772 = vmatprep.subr.mxu1 %v2935_v0 }
0x106a   :  { %2764 = vmatpush3.msra.mxu0 %v3008_v9  ;;  %2773 = vmatpush3.msra.mxu1 %v3067_v38 }
0x106b   :  { %2766 = vmatmul.mubr.msk.f32.vlgmr.msra.gmra.mxu0 %vm81_vm1, %v1708_v57  ;;  %2774 = vmatprep.subr.mxu1 %v2935_v0 }
0x106c   :  { %2779 = vmatprep.subr.mxu0 %v2935_v0  ;;  %2775 = vmatpush3.msra.mxu1 %v3076_v40 }
0x106d   :  { %2780 = vmatpush3.msra.mxu0 %v3041_v31  ;;  %2776 = vmatprep.mubr.msk.f32.mxu1 %vm2936_vm0, %v2935_v0 }
0x106e   :  { %2781 = vmatprep.subr.mxu0 %v2935_v0  ;;  %2790 = vmatprep.subr.mxu1 %v2935_v0 }
0x106f   :  { %2782 = vmatpush3.msra.mxu0 %v3058_v36  ;;  %2787 = vmatprep.mubr.msk.f32.mxu0 %vm2936_vm0, %v2935_v0  ;;  %v203_v36 = vadd.f32 %v3027_v15, %v3153_v56 }
0x1070   :  { %2783 = vmatprep.subr.mxu0 %v2935_v0 }
0x1071   :  { %2784 = vmatpush3.msra.mxu0 %v3081_v41 }
0x1072   :  { %2785 = vmatprep.subr.mxu0 %v2935_v0 }
0x1073   :  { %2786 = vmatpush3.msra.mxu0 %v3102_v45 }
0x1074   :  { %2801 = vmatprep.subr.mxu0 %v2935_v0 }
0x1123   :  { %v1702_v3 = vpop.f32.mrf.mxu0 }
0x1124   :  { %v1777_v4 = vpop.f32.mrf.mxu1 }
0x1125   :  { %v1778_v7 = vadd.f32 %v1777_v4, %v1702_v3  ;;  %v2745_v9 = vpop.f32.mrf.mxu0 }
0x1126   :  { %v2756_v31 = vpop.f32.mrf.mxu1 }
0x1127   :  { %v1781_v33 = vadd.f32 %v3160_v58, %v1778_v7 }
0x1129   :  { %v1782_v35 = vmul.f32 %v1781_v33, %v3030_v20 }
0x112b   :  { %2876 = vtanh.f32 %v1782_v35  ;;  %v1874_v38 = vpop.f32.mrf.mxu0 }
0x112c   :  { %v1878_v40 = vadd.f32 %v1874_v38, %v203_v36 }
0x112d   :  { %v2767_v41 = vpop.f32.mrf.mxu0 }
0x112e   :  { %v1879_v45 = vmul.f32 %v1878_v40, %v3030_v20 }
0x1130   :  { %2878 = vtanh.f32 %v1879_v45 }
0x1138   :  { %v2877_v59 = vpop.eup %2876 }
0x1139   :  { %1788 = vrot.lane.b32.xlu0 %v2877_v59, %s2938_s17  ;;  %v1784_v61 = vmul.f32 0.5, %v2877_v59 }
0x113b   :  { %v1785_v62 = vadd.f32 0.5, %v1784_v61 }
0x113d   :  { %v2879_v60 = vpop.eup %2878  ;;  %v1786_v6 = vmul.f32 %v1785_v62, %v3402_v42 }
0x113e   :  { %1885 = vrot.lane.b32.xlu1 %v2879_v60, %s2938_s17  ;;  %v1881_v1 = vmul.f32 0.5, %v2879_v60 }
0x1140   :  { %v1882_v15 = vadd.f32 0.5, %v1881_v1 }
0x1142   :  { %v1883_v10 = vmul.f32 %v1882_v15, %v3404_v44 }
0x11ab   :  { %v1789_v63 = vpop.permute.xlu0 %1788 }
0x11ac   :  { %v1791_v2 = vmul.f32 %v1789_v63, %v1785_v62 }
0x11ae   :  { %1793 = vrot.lane.b32.xlu0 %v1791_v2, %s2939_s18 }
0x11b0   :  { %v1886_v56 = vpop.permute.xlu1 %1885 }
0x11b1   :  { %v1888_v5 = vmul.f32 %v1886_v56, %v1882_v15 }
0x11b3   :  { %1890 = vrot.lane.b32.xlu1 %v1888_v5, %s2939_s18 }
0x1220   :  { %v1794_v8 = vpop.permute.xlu0 %1793 }
0x1221   :  { %v3459_v52 = vadd.f32 %v1794_v8, %v1786_v6 }
0x1223   :  { %2880 = vtanh.f32 %v3459_v52 }
0x1225   :  { %v1891_v11 = vpop.permute.xlu1 %1890 }
0x1226   :  { %v3463_v12 = vadd.f32 %v1891_v11, %v1883_v10 }
0x1228   :  { %2882 = vtanh.f32 %v3463_v12 }
0x1230   :  { %v2881_v13 = vpop.eup %2880 }
0x1231   :  { %1799 = vrot.lane.b32.xlu0 %v2881_v13, %s2938_s17 }
0x1235   :  { %v2883_v14 = vpop.eup %2882 }
0x1236   :  { %1896 = vrot.lane.b32.xlu1 %v2883_v14, %s2938_s17 }
0x12a3   :  { %v1800_v16 = vpop.permute.xlu0 %1799 }
0x12a4   :  { %v1802_v17 = vmul.f32 %v1800_v16, %v1785_v62 }
0x12a6   :  { %1804 = vrot.lane.b32.xlu0 %v1802_v17, %s2939_s18 }
0x12a8   :  { %v1897_v18 = vpop.permute.xlu1 %1896 }
0x12a9   :  { %v1899_v19 = vmul.f32 %v1897_v18, %v1882_v15 }
0x12ab   :  { %1973 = vrot.lane.b32.xlu1 %v1899_v19, %s2939_s18 }
0x1318   :  { %v1805_v21 = vpop.permute.xlu0 %1804 }
0x1319   :  { %1807 = vst.msk [vmem:[%s3560_s4 + $0x28] sm:$0xff] %vm81_vm1, %v1805_v21  ;;  %2777 = vmatmul.mubr.msk.f32.vlgmr.msra.gmra.mxu1 %vm81_vm1, %v1805_v21 }
0x131a   :  { %2791 = vmatpush3.msra.mxu1 %v2896_v22  ;;  %2798 = vmatprep.mubr.msk.f32.mxu1 %vm2936_vm0, %v2935_v0 }
0x131b   :  { %2792 = vmatprep.subr.mxu1 %v2935_v0 }
0x131c   :  { %2793 = vmatpush3.msra.mxu1 %v2897_v24 }
0x131d   :  { %2794 = vmatprep.subr.mxu1 %v2935_v0  ;;  %v1974_v25 = vpop.permute.xlu1 %1973 }
0x131e   :  { %2795 = vmatpush3.msra.mxu1 %v2898_v26  ;;  %2788 = vmatmul.mubr.msk.f32.vlgmr.msra.gmra.mxu0 %vm81_vm1, %v1974_v25 }
0x131f   :  { %2796 = vmatprep.subr.mxu1 %v2935_v0  ;;  %2802 = vmatpush3.msra.mxu0 %v2899_v53 }
0x1320   :  { %2797 = vmatpush3.msra.mxu1 %v2900_v23  ;;  %2803 = vmatprep.subr.mxu0 %v2935_v0 }
0x1321   :  { %2799 = vmatmul.mubr.msk.f32.vlgmr.msra.gmra.mxu1 %vm81_vm1, %v1974_v25  ;;  %2812 = vmatprep.subr.mxu1 %v2935_v0 }
0x1322   :  { %2813 = vmatpush3.msra.mxu1 %v2901_v27  ;;  %2804 = vmatpush3.msra.mxu0 %v2902_v28 }
0x1323   :  { %2814 = vmatprep.subr.mxu1 %v2935_v0  ;;  %2805 = vmatprep.subr.mxu0 %v2935_v0 }
0x1324   :  { %2815 = vmatpush3.msra.mxu1 %v2903_v29  ;;  %2806 = vmatpush3.msra.mxu0 %v2904_v32 }
0x1325   :  { %2816 = vmatprep.subr.mxu1 %v2935_v0  ;;  %2807 = vmatprep.subr.mxu0 %v2935_v0 }
0x1326   :  { %2817 = vmatpush3.msra.mxu1 %v2905_v30  ;;  %2808 = vmatpush3.msra.mxu0 %v2906_v34 }
0x1327   :  { %2818 = vmatprep.subr.mxu1 %v2935_v0  ;;  %2809 = vmatprep.mubr.msk.f32.mxu0 %vm2936_vm0, %v2935_v0 }
0x1328   :  { %2819 = vmatpush3.msra.mxu1 %v2907_v37  ;;  %2820 = vmatprep.mubr.msk.f32.mxu1 %vm2936_vm0, %v2935_v0 }
0x13d9   :  { %v1968_v39 = vpop.f32.mrf.mxu1 }
0x13db   :  { %v2778_v42 = vpop.f32.mrf.mxu1 }
0x13de   :  { %v2043_v43 = vpop.f32.mrf.mxu0 }
0x13df   :  { %v2044_v44 = vadd.f32 %v2043_v43, %v1968_v39 }
0x13e0   :  { %v2789_v47 = vpop.f32.mrf.mxu0 }
0x13e1   :  { %v2047_v48 = vadd.f32 %v3160_v58, %v2044_v44  ;;  %v2140_v49 = vpop.f32.mrf.mxu1 }
0x13e2   :  { %v2144_v51 = vadd.f32 %v2140_v49, %v208_v54 }
0x13e3   :  { %v2048_v50 = vmul.f32 %v2047_v48, %v3030_v20  ;;  %v2800_v57 = vpop.f32.mrf.mxu1 }
0x13e4   :  { %v2145_v0 = vmul.f32 %v2144_v51, %v3030_v20 }
0x13e5   :  { %2884 = vtanh.f32 %v2048_v50 }
0x13e6   :  { %2886 = vtanh.f32 %v2145_v0 }
0x13f2   :  { %v2885_v3 = vpop.eup %2884 }
0x13f3   :  { %v2887_v4 = vpop.eup %2886  ;;  %2054 = vrot.lane.b32.xlu0 %v2885_v3, %s2938_s17  ;;  %v2050_v7 = vmul.f32 0.5, %v2885_v3 }
0x13f4   :  { %2151 = vrot.lane.b32.xlu1 %v2887_v4, %s2938_s17  ;;  %v2147_v55 = vmul.f32 0.5, %v2887_v4 }
0x13f5   :  { %v2051_v9 = vadd.f32 0.5, %v2050_v7 }
0x13f6   :  { %v2148_v58 = vadd.f32 0.5, %v2147_v55 }
0x13f7   :  { %v2052_v38 = vmul.f32 %v2051_v9, %v3459_v52 }
0x13f8   :  { %v2149_v41 = vmul.f32 %v2148_v58, %v3463_v12  ;;  %v2909_v12 = vld [vmem:[%s3559_s3 + $0x1] ss:$0 sm:$0xff]  ;;  %s2940_s3 = smov 96  }
0x1465   :  { %v2055_v31 = vpop.permute.xlu0 %2054 }
0x1466   :  { %v2057_v33 = vmul.f32 %v2055_v31, %v2051_v9  ;;  %v2152_v35 = vpop.permute.xlu1 %2151 }
0x1467   :  { %v2154_v36 = vmul.f32 %v2152_v35, %v2148_v58 }
0x1468   :  { %2059 = vrot.lane.b32.xlu0 %v2057_v33, %s2939_s18 }
0x1469   :  { %2156 = vrot.lane.b32.xlu1 %v2154_v36, %s2939_s18 }
0x14da   :  { %v2060_v40 = vpop.permute.xlu0 %2059 }
0x14db   :  { %v2062_v45 = vadd.f32 %v2060_v40, %v2052_v38  ;;  %v2157_v59 = vpop.permute.xlu1 %2156 }
0x14dc   :  { %v2159_v60 = vadd.f32 %v2157_v59, %v2149_v41 }
0x14dd   :  { %2888 = vtanh.f32 %v2062_v45 }
0x14de   :  { %2890 = vtanh.f32 %v2159_v60 }
0x14ea   :  { %v2889_v61 = vpop.eup %2888 }
0x14eb   :  { %v2891_v62 = vpop.eup %2890  ;;  %2065 = vrot.lane.b32.xlu0 %v2889_v61, %s2938_s17 }
0x14ec   :  { %2162 = vrot.lane.b32.xlu1 %v2891_v62, %s2938_s17 }
0x155d   :  { %v2066_v63 = vpop.permute.xlu0 %2065 }
0x155e   :  { %v2068_v1 = vmul.f32 %v2066_v63, %v2051_v9  ;;  %v2163_v2 = vpop.permute.xlu1 %2162 }
0x155f   :  { %v2165_v15 = vmul.f32 %v2163_v2, %v2148_v58 }
0x1560   :  { %2070 = vrot.lane.b32.xlu0 %v2068_v1, %s2939_s18 }
0x1561   :  { %2239 = vrot.lane.b32.xlu1 %v2165_v15, %s2939_s18 }
0x15d2   :  { %v2071_v56 = vpop.permute.xlu0 %2070 }
0x15d3   :  { %2073 = vst.msk [vmem:[%s3560_s4 + $0x30] sm:$0xff] %vm81_vm1, %v2071_v56  ;;  %v2240_v5 = vpop.permute.xlu1 %2239  ;;  %2810 = vmatmul.mubr.msk.f32.vlgmr.msra.gmra.mxu0 %vm81_vm1, %v2071_v56 }
0x15d4   :  { %2341 = vst.msk [vmem:[%s3561_s5] sm:$0xff] %vm81_vm1, %v2240_v5  ;;  %2821 = vmatmul.mubr.msk.f32.vlgmr.msra.gmra.mxu1 %vm81_vm1, %v2240_v5 }
0x1693   :  { %v2234_v6 = vpop.f32.mrf.mxu0 }
0x1694   :  { %v2309_v8 = vpop.f32.mrf.mxu1 }
0x1695   :  { %v2310_v52 = vadd.f32 %v2309_v8, %v2234_v6  ;;  %v2811_v10 = vpop.f32.mrf.mxu0 }
0x1696   :  { %v2822_v11 = vpop.f32.mrf.mxu1 }
0x1697   :  { %v2313_v13 = vadd.f32 %v2909_v12, %v2310_v52 }
0x1699   :  { %v2314_v14 = vmul.f32 %v2313_v13, %v3030_v20 }
0x169b   :  { %2892 = vtanh.f32 %v2314_v14 }
0x16a8   :  { %v2893_v16 = vpop.eup %2892 }
0x16a9   :  { %2320 = vrot.lane.b32.xlu0 %v2893_v16, %s2938_s17  ;;  %v2316_v17 = vmul.f32 0.5, %v2893_v16 }
0x16ab   :  { %v2317_v18 = vadd.f32 0.5, %v2316_v17 }
0x16ad   :  { %v2318_v22 = vmul.f32 %v2317_v18, %v2062_v45 }
0x171b   :  { %v2321_v19 = vpop.permute.xlu0 %2320 }
0x171c   :  { %v2323_v21 = vmul.f32 %v2321_v19, %v2317_v18 }
0x171e   :  { %2325 = vrot.lane.b32.xlu1 %v2323_v21, %s2939_s18 }
0x1790   :  { %v2326_v24 = vpop.permute.xlu1 %2325 }
0x1791   :  { %v2328_v25 = vadd.f32 %v2326_v24, %v2318_v22 }
0x1793   :  { %2894 = vtanh.f32 %v2328_v25 }
0x17a0   :  { %v2895_v26 = vpop.eup %2894 }
0x17a1   :  { %2331 = vrot.lane.b32.xlu0 %v2895_v26, %s2938_s17 }
0x17a5   :  { %2343 = vrot.lane.b32.xlu0 %v2159_v60, %s2940_s3 }
0x1813   :  { %v2332_v20 = vpop.permute.xlu0 %2331 }
0x1814   :  { %v2334_v53 = vmul.f32 %v2332_v20, %v2317_v18 }
0x1816   :  { %2336 = vrot.lane.b32.xlu1 %v2334_v53, %s2939_s18 }
0x1817   :  { %v2344_v23 = vpop.permute.xlu0 %2343 }
0x1818   :  { %2346 = vst.msk [vmem:[%s3562_s6] sm:$0xff] %vm81_vm1, %v2344_v23 }
0x181a   :  { %2350 = vrot.lane.b32.xlu1 %v2328_v25, %s2940_s3 }
0x1888   :  { %v2337_v27 = vpop.permute.xlu1 %2336 }
0x1889   :  { %2339 = vst.msk [vmem:[%s3560_s4 + $0x38] sm:$0xff] %vm81_vm1, %v2337_v27  ;;  %2405 = vst.msk [vmem:[%s3561_s5 + $0x8] sm:$0xff] %vm81_vm1, %v2337_v27 }
0x188c   :  { %v2351_v28 = vpop.permute.xlu1 %2350 }
0x188d   :  { %2406 = vst.msk [vmem:[%s3562_s6 + $0x8] sm:$0xff] %vm81_vm1, %v2351_v28 }
0x188e   :  { %2367 = vsyncpa [#allocation3], 1 }

</bundles_post_ra>
